<compile_context>
chip_gen: v5e
topology: v5e:2x2
jax: 0.10.0
libtpu: 0.0.40
codegen_flags: <defaults>
</compile_context>

<pallas_src>
import jax
import jax.numpy as jnp
from jax.experimental import pallas as pl
from jax.experimental.pallas import tpu as pltpu

HIDDEN_SIZE = 128
INPUT_SIZE = 3
NUM_CLASSES = 2
PADDED_CLASSES = 128       # lane-dense FC output width; sliced to NUM_CLASSES outside
MAX_TIME_CHUNK = 16        # bound on per-chunk unroll (instruction-memory/live-range)
RECURRENT_MATMUL_DTYPE = jnp.float32   # set to jnp.bfloat16 for the v6e/v7x MXU lever


def lstm_classifier_kernel(x_ref, wih_ref, bias_ref, whh_ref, wfc_ref, bfc_ref,
                           out_ref, xp_ref, h_ref, c_ref):
    """One time-chunk of the LSTM recurrence (+ final FC on the last chunk).

    x_ref   : (T*Bt, In)   raw inputs for this chunk, time-major rows
    wih_ref : (In, 4H)     input weight, pre-transposed, gates [i,f,g,o]
    bias_ref: (1, 4H)      b_ih + b_hh
    whh_ref : (H, 4H)      recurrent weight, pre-transposed
    wfc_ref : (H, CP)      FC weight, pre-transposed, zero-padded to CP lanes
    bfc_ref : (1, CP)      FC bias, zero-padded
    out_ref : (Bt, CP)     output block (written on the last time-chunk only)
    xp_ref  : (T*Bt, 4H)   VMEM scratch: per-chunk input projection
    h_ref/c_ref: (Bt, H)   VMEM scratch: state carried across time-chunks
    """
    TB, _ = x_ref.shape
    H = whh_ref.shape[0]
    BT = h_ref.shape[0]
    T = TB // BT
    tc = pl.program_id(1)

    @pl.when(tc == 0)
    def _():
        h_ref[...] = jnp.zeros_like(h_ref)
        c_ref[...] = jnp.zeros_like(c_ref)

    # Fused input projection for the whole chunk: one MXU matmul into VMEM.
    # (Keeps per-token HBM traffic at 12 B instead of a 2 KiB xproj round trip.)
    xp_ref[...] = (jnp.dot(x_ref[...], wih_ref[...],
                           preferred_element_type=jnp.float32)
                   + bias_ref[...])

    whh = whh_ref[...]                       # hoisted; no re-load inside the loop
    mm_dtype = whh.dtype

    def step(t, carry):
        h, c = carry
        row = pl.multiple_of(t * BT, 8)      # BT is a multiple of 8 -> aligned slice
        gates = xp_ref[pl.ds(row, BT), :] + jnp.dot(
            h.astype(mm_dtype), whh, preferred_element_type=jnp.float32)
        # PyTorch gate order [i, f, g, o]:
        #   c' = sigmoid(f)*c + sigmoid(i)*tanh(g) only needs the first 3H columns;
        #   sigmoid(o) is off that chain and overlaps with tanh(c').
        i_f = jax.nn.sigmoid(gates[:, :2 * H])
        g = jnp.tanh(gates[:, 2 * H:3 * H])
        c_new = i_f[:, H:] * c + i_f[:, :H] * g
        o = jax.nn.sigmoid(gates[:, 3 * H:])
        h_new = o * jnp.tanh(c_new)
        return h_new, c_new

    # Bounded unroll: T <= MAX_TIME_CHUNK by construction.
    h_f, c_f = jax.lax.fori_loop(0, T, step, (h_ref[...], c_ref[...]), unroll=True)
    h_ref[...] = h_f
    c_ref[...] = c_f

    @pl.when(tc == pl.num_programs(1) - 1)
    def _():
        out_ref[...] = (jnp.dot(h_f, wfc_ref[...],
                                preferred_element_type=jnp.float32)
                        + bfc_ref[...]).astype(out_ref.dtype)


def _pick_time_chunk(S, max_chunk=MAX_TIME_CHUNK):
    t = min(S, max_chunk)
    while S % t != 0:
        t -= 1
    return t


def rnn_classifier_forward(x, params):
    """x: (B, S, In) batch-first like PyTorch. Returns (B, num_classes)."""
    w_ih, w_hh, b_ih, b_hh, w_fc, b_fc = params
    B, S, In = x.shape
    H = w_hh.shape[1]
    C = w_fc.shape[0]
    CP = PADDED_CLASSES

    # Pad batch to a sublane multiple; split across 2 blocks (v7x dual-TC) when
    # the padded batch is >= 16, otherwise keep a trivial size-1 parallel axis.
    B_pad = max(8, ((B + 7) // 8) * 8)
    NB = 2 if (B_pad >= 16 and B_pad % 16 == 0) else 1
    Bt = B_pad // NB

    T = _pick_time_chunk(S)
    NT = S // T

    xf = x.astype(jnp.float32)
    if B_pad != B:
        xf = jnp.concatenate(
            [xf, jnp.zeros((B_pad - B, S, In), jnp.float32)], axis=0)

    # (B,S,In) -> (S,B,In) -> (NB, S*Bt, In): each grid step sees a contiguous
    # time-major (T*Bt, In) slab (row t*Bt + b = batch b at step t of the chunk).
    x_blk = (jnp.transpose(xf, (1, 0, 2))
             .reshape(S, NB, Bt, In)
             .transpose(1, 0, 2, 3)
             .reshape(NB, S * Bt, In))

    wih_t = w_ih.T.astype(jnp.float32)                           # (In, 4H)
    bias = (b_ih + b_hh).astype(jnp.float32).reshape(1, 4 * H)   # (1, 4H)
    whh_t = w_hh.T.astype(RECURRENT_MATMUL_DTYPE)                # (H, 4H)
    wfc_pad = jnp.zeros((H, CP), jnp.float32).at[:, :C].set(w_fc.T.astype(jnp.float32))
    bfc_pad = jnp.zeros((1, CP), jnp.float32).at[:, :C].set(
        b_fc.astype(jnp.float32).reshape(1, C))

    const = lambda b, t: (0, 0)
    out_pad = pl.pallas_call(
        lstm_classifier_kernel,
        out_shape=jax.ShapeDtypeStruct((B_pad, CP), jnp.float32),
        grid_spec=pltpu.PrefetchScalarGridSpec(
            num_scalar_prefetch=0,
            grid=(NB, NT),
            in_specs=[
                pl.BlockSpec((None, T * Bt, In), lambda b, t: (b, t, 0)),  # x chunk
                pl.BlockSpec((In, 4 * H), const),    # W_ih^T
                pl.BlockSpec((1, 4 * H), const),     # b_ih + b_hh
                pl.BlockSpec((H, 4 * H), const),     # W_hh^T
                pl.BlockSpec((H, CP), const),        # W_fc^T (lane-padded)
                pl.BlockSpec((1, CP), const),        # b_fc (lane-padded)
            ],
            out_specs=pl.BlockSpec((Bt, CP), lambda b, t: (b, 0)),
            scratch_shapes=[
                pltpu.VMEM((T * Bt, 4 * H), jnp.float32),   # per-chunk x projection
                pltpu.VMEM((Bt, H), jnp.float32),           # h carry
                pltpu.VMEM((Bt, H), jnp.float32),           # c carry
            ],
        ),
        compiler_params=pltpu.CompilerParams(
            dimension_semantics=("parallel", "arbitrary")),
    )(x_blk, wih_t, bias, whh_t, wfc_pad, bfc_pad)
    return out_pad[:B, :C]


def init_params(key, input_size, hidden_size, num_classes):
    """Deterministic init matching PyTorch parameter shapes (uniform +-1/sqrt(H))."""
    ks = jax.random.split(key, 6)
    bound = 1.0 / jnp.sqrt(hidden_size)
    w_ih = jax.random.uniform(ks[0], (4 * hidden_size, input_size),
                              jnp.float32, -bound, bound)
    w_hh = jax.random.uniform(ks[1], (4 * hidden_size, hidden_size),
                              jnp.float32, -bound, bound)
    b_ih = jax.random.uniform(ks[2], (4 * hidden_size,), jnp.float32, -bound, bound)
    b_hh = jax.random.uniform(ks[3], (4 * hidden_size,), jnp.float32, -bound, bound)
    w_fc = jax.random.uniform(ks[4], (num_classes, hidden_size),
                              jnp.float32, -bound, bound)
    b_fc = jax.random.uniform(ks[5], (num_classes,), jnp.float32, -bound, bound)
    return (w_ih, w_hh, b_ih, b_hh, w_fc, b_fc)


def reference_forward(x, params):
    """Pure-JAX reference implementing PyTorch LSTM (gate order i,f,g,o) + Linear."""
    w_ih, w_hh, b_ih, b_hh, w_fc, b_fc = params
    B, S, In = x.shape
    H = w_hh.shape[1]
    h = jnp.zeros((B, H), jnp.float32)
    c = jnp.zeros((B, H), jnp.float32)

    def step(carry, x_t):
        h, c = carry
        gates = x_t @ w_ih.T + b_ih + h @ w_hh.T + b_hh
        i = jax.nn.sigmoid(gates[:, 0 * H:1 * H])
        f = jax.nn.sigmoid(gates[:, 1 * H:2 * H])
        g = jnp.tanh(gates[:, 2 * H:3 * H])
        o = jax.nn.sigmoid(gates[:, 3 * H:4 * H])
        c = f * c + i * g
        h = o * jnp.tanh(c)
        return (h, c), None

    (h, c), _ = jax.lax.scan(step, (h, c), jnp.transpose(x, (1, 0, 2)))
    return h @ w_fc.T + b_fc


if __name__ == "__main__":
    key = jax.random.PRNGKey(0)
    kx, kp, kx2 = jax.random.split(key, 3)
    params = init_params(kp, INPUT_SIZE, HIDDEN_SIZE, NUM_CLASSES)

    # Small shape: single time chunk, single batch block.
    B, S = 8, 8
    x = jax.random.normal(kx, (B, S, INPUT_SIZE), jnp.float32)
    out = jax.block_until_ready(rnn_classifier_forward(x, params))
    ref = reference_forward(x, params)
    assert out.shape == (B, NUM_CLASSES)
    assert jnp.allclose(out, ref, atol=1e-4, rtol=1e-4), (out, ref)

    # Multi-chunk + batch-split path (NT > 1, NB = 2), exercising the h/c carry.
    B2, S2 = 16, 32
    x2 = jax.random.normal(kx2, (B2, S2, INPUT_SIZE), jnp.float32)
    out2 = jax.block_until_ready(rnn_classifier_forward(x2, params))
    ref2 = reference_forward(x2, params)
    assert out2.shape == (B2, NUM_CLASSES)
    assert jnp.allclose(out2, ref2, atol=5e-4, rtol=5e-4), (out2, ref2)

    print("KERNEL_OK")
</pallas_src>

<mosaic_0001>
module attributes {stable_mosaic.version = 11 : i64} {
  func.func @lstm_classifier_kernel(%arg0: i32, %arg1: i32, %arg2: memref<1x64x3xf32, #tpu.memory_space<vmem>>, %arg3: memref<3x512xf32, #tpu.memory_space<vmem>>, %arg4: memref<1x512xf32, #tpu.memory_space<vmem>>, %arg5: memref<128x512xf32, #tpu.memory_space<vmem>>, %arg6: memref<128x128xf32, #tpu.memory_space<vmem>>, %arg7: memref<1x128xf32, #tpu.memory_space<vmem>>, %arg8: memref<8x128xf32, #tpu.memory_space<vmem>>, %arg9: memref<64x512xf32, #tpu.memory_space<vmem>>, %arg10: memref<8x128xf32, #tpu.memory_space<vmem>>, %arg11: memref<8x128xf32, #tpu.memory_space<vmem>>) attributes {dimension_semantics = [#tpu.dimension_semantics<parallel>, #tpu.dimension_semantics<arbitrary>], iteration_bounds = array<i64: 1, 1>, scalar_prefetch = 0 : i64, scratch_operands = 3 : i64, tpu.core_type = #tpu.core_type<tc>, window_params = [{transform_indices = @transform_0, window_bounds = array<i64: 1, 64, 3>}, {pipeline_mode = #tpu.pipeline_mode<synchronous>, transform_indices = @transform_1, window_bounds = array<i64: 3, 512>}, {pipeline_mode = #tpu.pipeline_mode<synchronous>, transform_indices = @transform_2, window_bounds = array<i64: 1, 512>}, {pipeline_mode = #tpu.pipeline_mode<synchronous>, transform_indices = @transform_3, window_bounds = array<i64: 128, 512>}, {pipeline_mode = #tpu.pipeline_mode<synchronous>, transform_indices = @transform_4, window_bounds = array<i64: 128, 128>}, {pipeline_mode = #tpu.pipeline_mode<synchronous>, transform_indices = @transform_5, window_bounds = array<i64: 1, 128>}, {transform_indices = @transform_6, window_bounds = array<i64: 8, 128>}]} {
    %c0_i32 = arith.constant 0 : i32
    %0 = arith.cmpi eq, %arg1, %c0_i32 : i32
    %1 = arith.extui %0 : i1 to i32
    %c0_i32_0 = arith.constant 0 : i32
    %2 = arith.cmpi ne, %1, %c0_i32_0 : i32
    scf.if %2 {
      %cst_62 = arith.constant 0.000000e+00 : f32
      %235 = vector.broadcast %cst_62 : f32 to vector<8x128xf32>
      %c0_63 = arith.constant 0 : index
      %c0_64 = arith.constant 0 : index
      %236 = vector.load %arg10[%c0_63, %c0_64] : memref<8x128xf32, #tpu.memory_space<vmem>>, vector<8x128xf32>
      tpu.vector_store %arg10[%c0_63, %c0_64], %235 {strides = array<i32>} : memref<8x128xf32, #tpu.memory_space<vmem>>, vector<8x128xf32>,
      %cst_65 = arith.constant 0.000000e+00 : f32
      %237 = vector.broadcast %cst_65 : f32 to vector<8x128xf32>
      %c0_66 = arith.constant 0 : index
      %c0_67 = arith.constant 0 : index
      %238 = vector.load %arg11[%c0_66, %c0_67] : memref<8x128xf32, #tpu.memory_space<vmem>>, vector<8x128xf32>
      tpu.vector_store %arg11[%c0_66, %c0_67], %237 {strides = array<i32>} : memref<8x128xf32, #tpu.memory_space<vmem>>, vector<8x128xf32>,
    } else {
    }
    %c0 = arith.constant 0 : index
    %c0_1 = arith.constant 0 : index
    %c0_2 = arith.constant 0 : index
    %3 = vector.load %arg2[%c0, %c0_1, %c0_2] : memref<1x64x3xf32, #tpu.memory_space<vmem>>, vector<1x64x3xf32>
    %4 = vector.shape_cast %3 : vector<1x64x3xf32> to vector<64x3xf32>
    %c0_3 = arith.constant 0 : index
    %c0_4 = arith.constant 0 : index
    %5 = vector.load %arg3[%c0_3, %c0_4] : memref<3x512xf32, #tpu.memory_space<vmem>>, vector<3x512xf32>
    %cst = arith.constant dense<0.000000e+00> : vector<64x512xf32>
    %6 = tpu.matmul %4, %5, %cst {dimension_numbers = #tpu.dot_dimension_numbers<[1], [0], [0], [1], [0, 0, 1, 1], [], []>} : vector<64x3xf32>, vector<3x512xf32>, vector<64x512xf32> -> vector<64x512xf32>
    %c0_5 = arith.constant 0 : index
    %c0_6 = arith.constant 0 : index
    %7 = vector.load %arg4[%c0_5, %c0_6] : memref<1x512xf32, #tpu.memory_space<vmem>>, vector<1x512xf32>
    %8 = vector.broadcast %7 : vector<1x512xf32> to vector<64x512xf32>
    %9 = arith.addf %6, %8 : vector<64x512xf32>
    %c0_7 = arith.constant 0 : index
    %c0_8 = arith.constant 0 : index
    %10 = vector.load %arg9[%c0_7, %c0_8] : memref<64x512xf32, #tpu.memory_space<vmem>>, vector<64x512xf32>
    tpu.vector_store %arg9[%c0_7, %c0_8], %9 {strides = array<i32>} : memref<64x512xf32, #tpu.memory_space<vmem>>, vector<64x512xf32>,
    %c0_9 = arith.constant 0 : index
    %c0_10 = arith.constant 0 : index
    %11 = vector.load %arg5[%c0_9, %c0_10] : memref<128x512xf32, #tpu.memory_space<vmem>>, vector<128x512xf32>
    %c0_11 = arith.constant 0 : index
    %c0_12 = arith.constant 0 : index
    %12 = vector.load %arg10[%c0_11, %c0_12] : memref<8x128xf32, #tpu.memory_space<vmem>>, vector<8x128xf32>
    %c0_13 = arith.constant 0 : index
    %c0_14 = arith.constant 0 : index
    %13 = vector.load %arg11[%c0_13, %c0_14] : memref<8x128xf32, #tpu.memory_space<vmem>>, vector<8x128xf32>
    %c0_i32_15 = arith.constant 0 : i32
    %c8_i32 = arith.constant 8 : i32
    %14 = arith.muli %c0_i32_15, %c8_i32 : i32
    %15 = tpu.assume_multiple %14, 8 : i32
    %16 = arith.index_cast %15 : i32 to index
    %c0_16 = arith.constant 0 : index
    %17 = vector.load %arg9[%16, %c0_16] : memref<64x512xf32, #tpu.memory_space<vmem>>, vector<8x512xf32>
    %cst_17 = arith.constant dense<0.000000e+00> : vector<8x512xf32>
    %18 = tpu.matmul %12, %11, %cst_17 {dimension_numbers = #tpu.dot_dimension_numbers<[1], [0], [0], [1], [0, 0, 1, 1], [], []>} : vector<8x128xf32>, vector<128x512xf32>, vector<8x512xf32> -> vector<8x512xf32>
    %19 = arith.addf %17, %18 : vector<8x512xf32>
    %20 = vector.extract_strided_slice %19 {offsets = [0, 0], sizes = [8, 256], strides = [1, 1]} : vector<8x512xf32> to vector<8x256xf32>
    %21 = arith.negf %20 : vector<8x256xf32>
    %22 = math.exp %21 : vector<8x256xf32>
    %cst_18 = arith.constant 1.000000e+00 : f32
    %23 = vector.broadcast %cst_18 : f32 to vector<8x256xf32>
    %24 = arith.addf %23, %22 : vector<8x256xf32>
    %25 = arith.divf %23, %24 : vector<8x256xf32>
    %26 = vector.extract_strided_slice %19 {offsets = [0, 256], sizes = [8, 128], strides = [1, 1]} : vector<8x512xf32> to vector<8x128xf32>
    %27 = math.tanh %26 : vector<8x128xf32>
    %28 = vector.extract_strided_slice %25 {offsets = [0, 128], sizes = [8, 128], strides = [1, 1]} : vector<8x256xf32> to vector<8x128xf32>
    %29 = arith.mulf %28, %13 : vector<8x128xf32>
    %30 = vector.extract_strided_slice %25 {offsets = [0, 0], sizes = [8, 128], strides = [1, 1]} : vector<8x256xf32> to vector<8x128xf32>
    %31 = arith.mulf %30, %27 : vector<8x128xf32>
    %32 = arith.addf %29, %31 : vector<8x128xf32>
    %33 = vector.extract_strided_slice %19 {offsets = [0, 384], sizes = [8, 128], strides = [1, 1]} : vector<8x512xf32> to vector<8x128xf32>
    %34 = arith.negf %33 : vector<8x128xf32>
    %35 = math.exp %34 : vector<8x128xf32>
    %cst_19 = arith.constant 1.000000e+00 : f32
    %36 = vector.broadcast %cst_19 : f32 to vector<8x128xf32>
    %37 = arith.addf %36, %35 : vector<8x128xf32>
    %38 = arith.divf %36, %37 : vector<8x128xf32>
    %39 = math.tanh %32 : vector<8x128xf32>
    %40 = arith.mulf %38, %39 : vector<8x128xf32>
    %c1_i32 = arith.constant 1 : i32
    %c8_i32_20 = arith.constant 8 : i32
    %41 = arith.muli %c1_i32, %c8_i32_20 : i32
    %42 = tpu.assume_multiple %41, 8 : i32
    %43 = arith.index_cast %42 : i32 to index
    %c0_21 = arith.constant 0 : index
    %44 = vector.load %arg9[%43, %c0_21] : memref<64x512xf32, #tpu.memory_space<vmem>>, vector<8x512xf32>
    %cst_22 = arith.constant dense<0.000000e+00> : vector<8x512xf32>
    %45 = tpu.matmul %40, %11, %cst_22 {dimension_numbers = #tpu.dot_dimension_numbers<[1], [0], [0], [1], [0, 0, 1, 1], [], []>} : vector<8x128xf32>, vector<128x512xf32>, vector<8x512xf32> -> vector<8x512xf32>
    %46 = arith.addf %44, %45 : vector<8x512xf32>
    %47 = vector.extract_strided_slice %46 {offsets = [0, 0], sizes = [8, 256], strides = [1, 1]} : vector<8x512xf32> to vector<8x256xf32>
    %48 = arith.negf %47 : vector<8x256xf32>
    %49 = math.exp %48 : vector<8x256xf32>
    %cst_23 = arith.constant 1.000000e+00 : f32
    %50 = vector.broadcast %cst_23 : f32 to vector<8x256xf32>
    %51 = arith.addf %50, %49 : vector<8x256xf32>
    %52 = arith.divf %50, %51 : vector<8x256xf32>
    %53 = vector.extract_strided_slice %46 {offsets = [0, 256], sizes = [8, 128], strides = [1, 1]} : vector<8x512xf32> to vector<8x128xf32>
    %54 = math.tanh %53 : vector<8x128xf32>
    %55 = vector.extract_strided_slice %52 {offsets = [0, 128], sizes = [8, 128], strides = [1, 1]} : vector<8x256xf32> to vector<8x128xf32>
    %56 = arith.mulf %55, %32 : vector<8x128xf32>
    %57 = vector.extract_strided_slice %52 {offsets = [0, 0], sizes = [8, 128], strides = [1, 1]} : vector<8x256xf32> to vector<8x128xf32>
    %58 = arith.mulf %57, %54 : vector<8x128xf32>
    %59 = arith.addf %56, %58 : vector<8x128xf32>
    %60 = vector.extract_strided_slice %46 {offsets = [0, 384], sizes = [8, 128], strides = [1, 1]} : vector<8x512xf32> to vector<8x128xf32>
    %61 = arith.negf %60 : vector<8x128xf32>
    %62 = math.exp %61 : vector<8x128xf32>
    %cst_24 = arith.constant 1.000000e+00 : f32
    %63 = vector.broadcast %cst_24 : f32 to vector<8x128xf32>
    %64 = arith.addf %63, %62 : vector<8x128xf32>
    %65 = arith.divf %63, %64 : vector<8x128xf32>
    %66 = math.tanh %59 : vector<8x128xf32>
    %67 = arith.mulf %65, %66 : vector<8x128xf32>
    %c2_i32 = arith.constant 2 : i32
    %c8_i32_25 = arith.constant 8 : i32
    %68 = arith.muli %c2_i32, %c8_i32_25 : i32
    %69 = tpu.assume_multiple %68, 8 : i32
    %70 = arith.index_cast %69 : i32 to index
    %c0_26 = arith.constant 0 : index
    %71 = vector.load %arg9[%70, %c0_26] : memref<64x512xf32, #tpu.memory_space<vmem>>, vector<8x512xf32>
    %cst_27 = arith.constant dense<0.000000e+00> : vector<8x512xf32>
    %72 = tpu.matmul %67, %11, %cst_27 {dimension_numbers = #tpu.dot_dimension_numbers<[1], [0], [0], [1], [0, 0, 1, 1], [], []>} : vector<8x128xf32>, vector<128x512xf32>, vector<8x512xf32> -> vector<8x512xf32>
    %73 = arith.addf %71, %72 : vector<8x512xf32>
    %74 = vector.extract_strided_slice %73 {offsets = [0, 0], sizes = [8, 256], strides = [1, 1]} : vector<8x512xf32> to vector<8x256xf32>
    %75 = arith.negf %74 : vector<8x256xf32>
    %76 = math.exp %75 : vector<8x256xf32>
    %cst_28 = arith.constant 1.000000e+00 : f32
    %77 = vector.broadcast %cst_28 : f32 to vector<8x256xf32>
    %78 = arith.addf %77, %76 : vector<8x256xf32>
    %79 = arith.divf %77, %78 : vector<8x256xf32>
    %80 = vector.extract_strided_slice %73 {offsets = [0, 256], sizes = [8, 128], strides = [1, 1]} : vector<8x512xf32> to vector<8x128xf32>
    %81 = math.tanh %80 : vector<8x128xf32>
    %82 = vector.extract_strided_slice %79 {offsets = [0, 128], sizes = [8, 128], strides = [1, 1]} : vector<8x256xf32> to vector<8x128xf32>
    %83 = arith.mulf %82, %59 : vector<8x128xf32>
    %84 = vector.extract_strided_slice %79 {offsets = [0, 0], sizes = [8, 128], strides = [1, 1]} : vector<8x256xf32> to vector<8x128xf32>
    %85 = arith.mulf %84, %81 : vector<8x128xf32>
    %86 = arith.addf %83, %85 : vector<8x128xf32>
    %87 = vector.extract_strided_slice %73 {offsets = [0, 384], sizes = [8, 128], strides = [1, 1]} : vector<8x512xf32> to vector<8x128xf32>
    %88 = arith.negf %87 : vector<8x128xf32>
    %89 = math.exp %88 : vector<8x128xf32>
    %cst_29 = arith.constant 1.000000e+00 : f32
    %90 = vector.broadcast %cst_29 : f32 to vector<8x128xf32>
    %91 = arith.addf %90, %89 : vector<8x128xf32>
    %92 = arith.divf %90, %91 : vector<8x128xf32>
    %93 = math.tanh %86 : vector<8x128xf32>
    %94 = arith.mulf %92, %93 : vector<8x128xf32>
    %c3_i32 = arith.constant 3 : i32
    %c8_i32_30 = arith.constant 8 : i32
    %95 = arith.muli %c3_i32, %c8_i32_30 : i32
    %96 = tpu.assume_multiple %95, 8 : i32
    %97 = arith.index_cast %96 : i32 to index
    %c0_31 = arith.constant 0 : index
    %98 = vector.load %arg9[%97, %c0_31] : memref<64x512xf32, #tpu.memory_space<vmem>>, vector<8x512xf32>
    %cst_32 = arith.constant dense<0.000000e+00> : vector<8x512xf32>
    %99 = tpu.matmul %94, %11, %cst_32 {dimension_numbers = #tpu.dot_dimension_numbers<[1], [0], [0], [1], [0, 0, 1, 1], [], []>} : vector<8x128xf32>, vector<128x512xf32>, vector<8x512xf32> -> vector<8x512xf32>
    %100 = arith.addf %98, %99 : vector<8x512xf32>
    %101 = vector.extract_strided_slice %100 {offsets = [0, 0], sizes = [8, 256], strides = [1, 1]} : vector<8x512xf32> to vector<8x256xf32>
    %102 = arith.negf %101 : vector<8x256xf32>
    %103 = math.exp %102 : vector<8x256xf32>
    %cst_33 = arith.constant 1.000000e+00 : f32
    %104 = vector.broadcast %cst_33 : f32 to vector<8x256xf32>
    %105 = arith.addf %104, %103 : vector<8x256xf32>
    %106 = arith.divf %104, %105 : vector<8x256xf32>
    %107 = vector.extract_strided_slice %100 {offsets = [0, 256], sizes = [8, 128], strides = [1, 1]} : vector<8x512xf32> to vector<8x128xf32>
    %108 = math.tanh %107 : vector<8x128xf32>
    %109 = vector.extract_strided_slice %106 {offsets = [0, 128], sizes = [8, 128], strides = [1, 1]} : vector<8x256xf32> to vector<8x128xf32>
    %110 = arith.mulf %109, %86 : vector<8x128xf32>
    %111 = vector.extract_strided_slice %106 {offsets = [0, 0], sizes = [8, 128], strides = [1, 1]} : vector<8x256xf32> to vector<8x128xf32>
    %112 = arith.mulf %111, %108 : vector<8x128xf32>
    %113 = arith.addf %110, %112 : vector<8x128xf32>
    %114 = vector.extract_strided_slice %100 {offsets = [0, 384], sizes = [8, 128], strides = [1, 1]} : vector<8x512xf32> to vector<8x128xf32>
    %115 = arith.negf %114 : vector<8x128xf32>
    %116 = math.exp %115 : vector<8x128xf32>
    %cst_34 = arith.constant 1.000000e+00 : f32
    %117 = vector.broadcast %cst_34 : f32 to vector<8x128xf32>
    %118 = arith.addf %117, %116 : vector<8x128xf32>
    %119 = arith.divf %117, %118 : vector<8x128xf32>
    %120 = math.tanh %113 : vector<8x128xf32>
    %121 = arith.mulf %119, %120 : vector<8x128xf32>
    %c4_i32 = arith.constant 4 : i32
    %c8_i32_35 = arith.constant 8 : i32
    %122 = arith.muli %c4_i32, %c8_i32_35 : i32
    %123 = tpu.assume_multiple %122, 8 : i32
    %124 = arith.index_cast %123 : i32 to index
    %c0_36 = arith.constant 0 : index
    %125 = vector.load %arg9[%124, %c0_36] : memref<64x512xf32, #tpu.memory_space<vmem>>, vector<8x512xf32>
    %cst_37 = arith.constant dense<0.000000e+00> : vector<8x512xf32>
    %126 = tpu.matmul %121, %11, %cst_37 {dimension_numbers = #tpu.dot_dimension_numbers<[1], [0], [0], [1], [0, 0, 1, 1], [], []>} : vector<8x128xf32>, vector<128x512xf32>, vector<8x512xf32> -> vector<8x512xf32>
    %127 = arith.addf %125, %126 : vector<8x512xf32>
    %128 = vector.extract_strided_slice %127 {offsets = [0, 0], sizes = [8, 256], strides = [1, 1]} : vector<8x512xf32> to vector<8x256xf32>
    %129 = arith.negf %128 : vector<8x256xf32>
    %130 = math.exp %129 : vector<8x256xf32>
    %cst_38 = arith.constant 1.000000e+00 : f32
    %131 = vector.broadcast %cst_38 : f32 to vector<8x256xf32>
    %132 = arith.addf %131, %130 : vector<8x256xf32>
    %133 = arith.divf %131, %132 : vector<8x256xf32>
    %134 = vector.extract_strided_slice %127 {offsets = [0, 256], sizes = [8, 128], strides = [1, 1]} : vector<8x512xf32> to vector<8x128xf32>
    %135 = math.tanh %134 : vector<8x128xf32>
    %136 = vector.extract_strided_slice %133 {offsets = [0, 128], sizes = [8, 128], strides = [1, 1]} : vector<8x256xf32> to vector<8x128xf32>
    %137 = arith.mulf %136, %113 : vector<8x128xf32>
    %138 = vector.extract_strided_slice %133 {offsets = [0, 0], sizes = [8, 128], strides = [1, 1]} : vector<8x256xf32> to vector<8x128xf32>
    %139 = arith.mulf %138, %135 : vector<8x128xf32>
    %140 = arith.addf %137, %139 : vector<8x128xf32>
    %141 = vector.extract_strided_slice %127 {offsets = [0, 384], sizes = [8, 128], strides = [1, 1]} : vector<8x512xf32> to vector<8x128xf32>
    %142 = arith.negf %141 : vector<8x128xf32>
    %143 = math.exp %142 : vector<8x128xf32>
    %cst_39 = arith.constant 1.000000e+00 : f32
    %144 = vector.broadcast %cst_39 : f32 to vector<8x128xf32>
    %145 = arith.addf %144, %143 : vector<8x128xf32>
    %146 = arith.divf %144, %145 : vector<8x128xf32>
    %147 = math.tanh %140 : vector<8x128xf32>
    %148 = arith.mulf %146, %147 : vector<8x128xf32>
    %c5_i32 = arith.constant 5 : i32
    %c8_i32_40 = arith.constant 8 : i32
    %149 = arith.muli %c5_i32, %c8_i32_40 : i32
    %150 = tpu.assume_multiple %149, 8 : i32
    %151 = arith.index_cast %150 : i32 to index
    %c0_41 = arith.constant 0 : index
    %152 = vector.load %arg9[%151, %c0_41] : memref<64x512xf32, #tpu.memory_space<vmem>>, vector<8x512xf32>
    %cst_42 = arith.constant dense<0.000000e+00> : vector<8x512xf32>
    %153 = tpu.matmul %148, %11, %cst_42 {dimension_numbers = #tpu.dot_dimension_numbers<[1], [0], [0], [1], [0, 0, 1, 1], [], []>} : vector<8x128xf32>, vector<128x512xf32>, vector<8x512xf32> -> vector<8x512xf32>
    %154 = arith.addf %152, %153 : vector<8x512xf32>
    %155 = vector.extract_strided_slice %154 {offsets = [0, 0], sizes = [8, 256], strides = [1, 1]} : vector<8x512xf32> to vector<8x256xf32>
    %156 = arith.negf %155 : vector<8x256xf32>
    %157 = math.exp %156 : vector<8x256xf32>
    %cst_43 = arith.constant 1.000000e+00 : f32
    %158 = vector.broadcast %cst_43 : f32 to vector<8x256xf32>
    %159 = arith.addf %158, %157 : vector<8x256xf32>
    %160 = arith.divf %158, %159 : vector<8x256xf32>
    %161 = vector.extract_strided_slice %154 {offsets = [0, 256], sizes = [8, 128], strides = [1, 1]} : vector<8x512xf32> to vector<8x128xf32>
    %162 = math.tanh %161 : vector<8x128xf32>
    %163 = vector.extract_strided_slice %160 {offsets = [0, 128], sizes = [8, 128], strides = [1, 1]} : vector<8x256xf32> to vector<8x128xf32>
    %164 = arith.mulf %163, %140 : vector<8x128xf32>
    %165 = vector.extract_strided_slice %160 {offsets = [0, 0], sizes = [8, 128], strides = [1, 1]} : vector<8x256xf32> to vector<8x128xf32>
    %166 = arith.mulf %165, %162 : vector<8x128xf32>
    %167 = arith.addf %164, %166 : vector<8x128xf32>
    %168 = vector.extract_strided_slice %154 {offsets = [0, 384], sizes = [8, 128], strides = [1, 1]} : vector<8x512xf32> to vector<8x128xf32>
    %169 = arith.negf %168 : vector<8x128xf32>
    %170 = math.exp %169 : vector<8x128xf32>
    %cst_44 = arith.constant 1.000000e+00 : f32
    %171 = vector.broadcast %cst_44 : f32 to vector<8x128xf32>
    %172 = arith.addf %171, %170 : vector<8x128xf32>
    %173 = arith.divf %171, %172 : vector<8x128xf32>
    %174 = math.tanh %167 : vector<8x128xf32>
    %175 = arith.mulf %173, %174 : vector<8x128xf32>
    %c6_i32 = arith.constant 6 : i32
    %c8_i32_45 = arith.constant 8 : i32
    %176 = arith.muli %c6_i32, %c8_i32_45 : i32
    %177 = tpu.assume_multiple %176, 8 : i32
    %178 = arith.index_cast %177 : i32 to index
    %c0_46 = arith.constant 0 : index
    %179 = vector.load %arg9[%178, %c0_46] : memref<64x512xf32, #tpu.memory_space<vmem>>, vector<8x512xf32>
    %cst_47 = arith.constant dense<0.000000e+00> : vector<8x512xf32>
    %180 = tpu.matmul %175, %11, %cst_47 {dimension_numbers = #tpu.dot_dimension_numbers<[1], [0], [0], [1], [0, 0, 1, 1], [], []>} : vector<8x128xf32>, vector<128x512xf32>, vector<8x512xf32> -> vector<8x512xf32>
    %181 = arith.addf %179, %180 : vector<8x512xf32>
    %182 = vector.extract_strided_slice %181 {offsets = [0, 0], sizes = [8, 256], strides = [1, 1]} : vector<8x512xf32> to vector<8x256xf32>
    %183 = arith.negf %182 : vector<8x256xf32>
    %184 = math.exp %183 : vector<8x256xf32>
    %cst_48 = arith.constant 1.000000e+00 : f32
    %185 = vector.broadcast %cst_48 : f32 to vector<8x256xf32>
    %186 = arith.addf %185, %184 : vector<8x256xf32>
    %187 = arith.divf %185, %186 : vector<8x256xf32>
    %188 = vector.extract_strided_slice %181 {offsets = [0, 256], sizes = [8, 128], strides = [1, 1]} : vector<8x512xf32> to vector<8x128xf32>
    %189 = math.tanh %188 : vector<8x128xf32>
    %190 = vector.extract_strided_slice %187 {offsets = [0, 128], sizes = [8, 128], strides = [1, 1]} : vector<8x256xf32> to vector<8x128xf32>
    %191 = arith.mulf %190, %167 : vector<8x128xf32>
    %192 = vector.extract_strided_slice %187 {offsets = [0, 0], sizes = [8, 128], strides = [1, 1]} : vector<8x256xf32> to vector<8x128xf32>
    %193 = arith.mulf %192, %189 : vector<8x128xf32>
    %194 = arith.addf %191, %193 : vector<8x128xf32>
    %195 = vector.extract_strided_slice %181 {offsets = [0, 384], sizes = [8, 128], strides = [1, 1]} : vector<8x512xf32> to vector<8x128xf32>
    %196 = arith.negf %195 : vector<8x128xf32>
    %197 = math.exp %196 : vector<8x128xf32>
    %cst_49 = arith.constant 1.000000e+00 : f32
    %198 = vector.broadcast %cst_49 : f32 to vector<8x128xf32>
    %199 = arith.addf %198, %197 : vector<8x128xf32>
    %200 = arith.divf %198, %199 : vector<8x128xf32>
    %201 = math.tanh %194 : vector<8x128xf32>
    %202 = arith.mulf %200, %201 : vector<8x128xf32>
    %c7_i32 = arith.constant 7 : i32
    %c8_i32_50 = arith.constant 8 : i32
    %203 = arith.muli %c7_i32, %c8_i32_50 : i32
    %204 = tpu.assume_multiple %203, 8 : i32
    %205 = arith.index_cast %204 : i32 to index
    %c0_51 = arith.constant 0 : index
    %206 = vector.load %arg9[%205, %c0_51] : memref<64x512xf32, #tpu.memory_space<vmem>>, vector<8x512xf32>
    %cst_52 = arith.constant dense<0.000000e+00> : vector<8x512xf32>
    %207 = tpu.matmul %202, %11, %cst_52 {dimension_numbers = #tpu.dot_dimension_numbers<[1], [0], [0], [1], [0, 0, 1, 1], [], []>} : vector<8x128xf32>, vector<128x512xf32>, vector<8x512xf32> -> vector<8x512xf32>
    %208 = arith.addf %206, %207 : vector<8x512xf32>
    %209 = vector.extract_strided_slice %208 {offsets = [0, 0], sizes = [8, 256], strides = [1, 1]} : vector<8x512xf32> to vector<8x256xf32>
    %210 = arith.negf %209 : vector<8x256xf32>
    %211 = math.exp %210 : vector<8x256xf32>
    %cst_53 = arith.constant 1.000000e+00 : f32
    %212 = vector.broadcast %cst_53 : f32 to vector<8x256xf32>
    %213 = arith.addf %212, %211 : vector<8x256xf32>
    %214 = arith.divf %212, %213 : vector<8x256xf32>
    %215 = vector.extract_strided_slice %208 {offsets = [0, 256], sizes = [8, 128], strides = [1, 1]} : vector<8x512xf32> to vector<8x128xf32>
    %216 = math.tanh %215 : vector<8x128xf32>
    %217 = vector.extract_strided_slice %214 {offsets = [0, 128], sizes = [8, 128], strides = [1, 1]} : vector<8x256xf32> to vector<8x128xf32>
    %218 = arith.mulf %217, %194 : vector<8x128xf32>
    %219 = vector.extract_strided_slice %214 {offsets = [0, 0], sizes = [8, 128], strides = [1, 1]} : vector<8x256xf32> to vector<8x128xf32>
    %220 = arith.mulf %219, %216 : vector<8x128xf32>
    %221 = arith.addf %218, %220 : vector<8x128xf32>
    %222 = vector.extract_strided_slice %208 {offsets = [0, 384], sizes = [8, 128], strides = [1, 1]} : vector<8x512xf32> to vector<8x128xf32>
    %223 = arith.negf %222 : vector<8x128xf32>
    %224 = math.exp %223 : vector<8x128xf32>
    %cst_54 = arith.constant 1.000000e+00 : f32
    %225 = vector.broadcast %cst_54 : f32 to vector<8x128xf32>
    %226 = arith.addf %225, %224 : vector<8x128xf32>
    %227 = arith.divf %225, %226 : vector<8x128xf32>
    %228 = math.tanh %221 : vector<8x128xf32>
    %229 = arith.mulf %227, %228 : vector<8x128xf32>
    %c8_i32_55 = arith.constant 8 : i32
    %c0_56 = arith.constant 0 : index
    %c0_57 = arith.constant 0 : index
    %230 = vector.load %arg10[%c0_56, %c0_57] : memref<8x128xf32, #tpu.memory_space<vmem>>, vector<8x128xf32>
    tpu.vector_store %arg10[%c0_56, %c0_57], %229 {strides = array<i32>} : memref<8x128xf32, #tpu.memory_space<vmem>>, vector<8x128xf32>,
    %c0_58 = arith.constant 0 : index
    %c0_59 = arith.constant 0 : index
    %231 = vector.load %arg11[%c0_58, %c0_59] : memref<8x128xf32, #tpu.memory_space<vmem>>, vector<8x128xf32>
    tpu.vector_store %arg11[%c0_58, %c0_59], %221 {strides = array<i32>} : memref<8x128xf32, #tpu.memory_space<vmem>>, vector<8x128xf32>,
    %c0_i32_60 = arith.constant 0 : i32
    %232 = arith.cmpi eq, %arg1, %c0_i32_60 : i32
    %233 = arith.extui %232 : i1 to i32
    %c0_i32_61 = arith.constant 0 : i32
    %234 = arith.cmpi ne, %233, %c0_i32_61 : i32
    scf.if %234 {
      %c0_62 = arith.constant 0 : index
      %c0_63 = arith.constant 0 : index
      %235 = vector.load %arg6[%c0_62, %c0_63] : memref<128x128xf32, #tpu.memory_space<vmem>>, vector<128x128xf32>
      %cst_64 = arith.constant dense<0.000000e+00> : vector<8x128xf32>
      %236 = tpu.matmul %229, %235, %cst_64 {dimension_numbers = #tpu.dot_dimension_numbers<[1], [0], [0], [1], [0, 0, 1, 1], [], []>} : vector<8x128xf32>, vector<128x128xf32>, vector<8x128xf32> -> vector<8x128xf32>
      %c0_65 = arith.constant 0 : index
      %c0_66 = arith.constant 0 : index
      %237 = vector.load %arg7[%c0_65, %c0_66] : memref<1x128xf32, #tpu.memory_space<vmem>>, vector<1x128xf32>
      %238 = vector.broadcast %237 : vector<1x128xf32> to vector<8x128xf32>
      %239 = arith.addf %236, %238 : vector<8x128xf32>
      %c0_67 = arith.constant 0 : index
      %c0_68 = arith.constant 0 : index
      %240 = vector.load %arg8[%c0_67, %c0_68] : memref<8x128xf32, #tpu.memory_space<vmem>>, vector<8x128xf32>
      tpu.vector_store %arg8[%c0_67, %c0_68], %239 {strides = array<i32>} : memref<8x128xf32, #tpu.memory_space<vmem>>, vector<8x128xf32>,
    } else {
    }
    return
  }
  func.func @transform_0(%arg0: i32, %arg1: i32) -> (i32, i32, i32) {
    %c0_i32 = arith.constant 0 : i32
    %c0_i32_0 = arith.constant 0 : i32
    return %arg0, %arg1, %c0_i32 : i32, i32, i32
  }
  func.func @transform_1(%arg0: i32, %arg1: i32) -> (i32, i32) {
    %c0_i32 = arith.constant 0 : i32
    %c0_i32_0 = arith.constant 0 : i32
    %c0_i32_1 = arith.constant 0 : i32
    return %c0_i32, %c0_i32_0 : i32, i32
  }
  func.func @transform_2(%arg0: i32, %arg1: i32) -> (i32, i32) {
    %c0_i32 = arith.constant 0 : i32
    %c0_i32_0 = arith.constant 0 : i32
    %c0_i32_1 = arith.constant 0 : i32
    return %c0_i32, %c0_i32_0 : i32, i32
  }
  func.func @transform_3(%arg0: i32, %arg1: i32) -> (i32, i32) {
    %c0_i32 = arith.constant 0 : i32
    %c0_i32_0 = arith.constant 0 : i32
    %c0_i32_1 = arith.constant 0 : i32
    return %c0_i32, %c0_i32_0 : i32, i32
  }
  func.func @transform_4(%arg0: i32, %arg1: i32) -> (i32, i32) {
    %c0_i32 = arith.constant 0 : i32
    %c0_i32_0 = arith.constant 0 : i32
    %c0_i32_1 = arith.constant 0 : i32
    return %c0_i32, %c0_i32_0 : i32, i32
  }
  func.func @transform_5(%arg0: i32, %arg1: i32) -> (i32, i32) {
    %c0_i32 = arith.constant 0 : i32
    %c0_i32_0 = arith.constant 0 : i32
    %c0_i32_1 = arith.constant 0 : i32
    return %c0_i32, %c0_i32_0 : i32, i32
  }
  func.func @transform_6(%arg0: i32, %arg1: i32) -> (i32, i32) {
    %c0_i32 = arith.constant 0 : i32
    %c0_i32_0 = arith.constant 0 : i32
    return %arg0, %c0_i32 : i32, i32
  }
}

</mosaic_0001>

<bundles_post_ra>
// kernel: tpu_custom_call.1
= control target key start
LH: loop header
LB: loop body
LE: loop exit
PB: predicated region body
PF: predicated region fallthrough
CT: control target
= control target key end

     0   :  { %11 = vsyncpa [#allocation6], 0  ;;  %s3077_s0 = inlined_call_operand.vmem [shape: f32[1,64,3], index: 0, kind: input, shape index: {}]   ;;  %s3078_s1 = inlined_call_operand.vmem [shape: f32[3,512], index: 1, kind: input, shape index: {}]   ;;  %s3079_s2 = inlined_call_operand.vmem [shape: f32[1,512], index: 2, kind: input, shape index: {}]   ;;  %s3080_s3 = inlined_call_operand.hbm [shape: f32[128,512], index: 3, kind: input, shape index: {}]   ;;  %s3081_s4 = inlined_call_operand.hbm [shape: f32[128,128], index: 4, kind: input, shape index: {}]   ;;  %s3082_s5 = inlined_call_operand.vmem [shape: f32[1,128], index: 5, kind: input, shape index: {}]   ;;  %s3083_s6 = inlined_call_operand.hbm [shape: f32[8,128], index: 6, kind: output, shape index: {}]  }
   0x1   :  { %12 = vsyncpa [#allocation9], 0 }
   0x2   :  { %13 = vsyncpa [#allocation7], 0  ;;  %s24_s23 = sshll.u32 %s3080_s3, 4  ;;  %s2032_s24 = smov [#allocation5]   ;;  %s25_s23 = int_to_ptr.hbm [resolvable:$true] %s24_s23 }
   0x3   :  { %s26_s25 = sshll.u32 %s2032_s24, 4  ;;  %s37_s28 = sshll.u32 %s3081_s4, 4  ;;  %s27_s25 = int_to_ptr.vmem [resolvable:$true] %s26_s25  ;;  %s38_s28 = int_to_ptr.hbm [resolvable:$true] %s37_s28 }
   0x4   :  { %s2033_s29 = smov 512   ;;  %s2034_s30 = smov 32  }
   0x5   :  { %32 = dma.hbm_to_vmem [thread:$0]  %s25_s23, 8192, %s27_s25, [#allocation6], %s2033_s29, %s2033_s29, %s2034_s30  }
   0x6   :  { %s2035_s7 = smov [#allocation8]   ;;  %s2036_s9 = smov 128  }
   0x7   :  { %s39_s8 = sshll.u32 %s2035_s7, 4  ;;  %s2037_s10 = smov 8   ;;  %s40_s8 = int_to_ptr.vmem [resolvable:$true] %s39_s8 }
   0x8   :  { %45 = dma.hbm_to_vmem [thread:$0]  %s38_s28, 2048, %s40_s8, [#allocation9], %s2036_s9, %s2036_s9, %s2037_s10  }
   0x9   :  { %2026 = dma.done.wait [#allocation6], 8192  }
   0xa   :  { %2027 = vsyncadd [#allocation6], 4294959104 }
   0xb   :  { %2028 = dma.done.wait [#allocation9], 2048  }
   0xc   :  { %2029 = vsyncadd [#allocation9], 4294965248  ;;  %v70_v0 = vld [vmem:[%s3078_s1] sm:$0x77]  ;;  %v71_v1 = vld [vmem:[%s3078_s1 + $0x8] sm:$0x77] }
   0xd   :  { %84 = vst [vmem:[#allocation1] ss:$2 sm:$0xff] %v70_v0  ;;  %vm116_vm0 = vcmask 1042432   ;;  %v62_v3 = vld [vmem:[%s3077_s0] sm:$0xff]  ;;  %vm91_vm1 = vcmask 23552   ;;  %v2093_v4 = vld [vmem:[%s3077_s0 + $0x28] sm:$0xff] }
   0xe   :  { %86 = vst [vmem:[#allocation1 + $0x10] ss:$2 sm:$0xff] %v71_v1  ;;  %v2100_v5 = vld [vmem:[%s3077_s0 + $0x30] sm:$0xff]  ;;  %v2105_v6 = vld [vmem:[%s3077_s0 + $0x38] sm:$0xff]  ;;  %v2118_v11 = vld [vmem:[#allocation5 + $0x1e0] sm:$0xff]  ;;  %s2039_s30 = smov [#allocation10]  }
   0xf   :  { %v2112_v10 = vld [vmem:[#allocation5 + $0x1e8] sm:$0xff]  ;;  %v2120_v12 = vld [vmem:[#allocation5 + $0x1f8] sm:$0xff]  ;;  %v2126_v14 = vld [vmem:[#allocation5 + $0x1f0] sm:$0xff]  ;;  %s1670_s7 = sshll.u32 %s2039_s30, 4  ;;  %s1672_s10 = sshll.u32 %s3083_s6, 4  ;;  %s1671_s7 = int_to_ptr.vmem [resolvable:$true] %s1670_s7  ;;  %s1673_s10 = int_to_ptr.hbm [resolvable:$true] %s1672_s10 }
  0x10   :  { %v2124_v13 = vld [vmem:[#allocation5 + $0x1c8] sm:$0xff]  ;;  %v2130_v15 = vld [vmem:[#allocation5 + $0x1c0] sm:$0xff]  ;;  %v2132_v16 = vld [vmem:[#allocation5 + $0x1d8] sm:$0xff] }
  0x11   :  { %v2136_v17 = vld [vmem:[#allocation5 + $0x1a8] sm:$0xff]  ;;  %v2138_v18 = vld [vmem:[#allocation5 + $0x1d0] sm:$0xff]  ;;  %v63_v19 = vld [vmem:[%s3077_s0 + $0x8] sm:$0xff] }
  0x12   :  { %v2147_v20 = vld [vmem:[#allocation5 + $0x1a0] sm:$0xff]  ;;  %v2150_v21 = vld [vmem:[#allocation5 + $0x188] sm:$0xff]  ;;  %v2155_v22 = vld [vmem:[#allocation5 + $0x1b8] sm:$0xff] }
  0x13   :  { %v2157_v23 = vld [vmem:[#allocation5 + $0x1b0] sm:$0xff]  ;;  %v2161_v24 = vld [vmem:[#allocation5 + $0x180] sm:$0xff]  ;;  %v2163_v25 = vld [vmem:[#allocation5 + $0x168] sm:$0xff] }
  0x14   :  { %v87_v2 = vld.sshfl [vmem:[#allocation1] sm:$0xff pattern:$0x75316420]  ;;  %v88_v7 = vld.sshfl [vmem:[#allocation1 + $0x8] sm:$0xff pattern:$0x75316420] }
  0x15   :  { %1690 = vmatpush.msk.msra.mxu0 %vm116_vm0, %v87_v2  ;;  %1750 = vmatpush.msk.msra.mxu1 %vm116_vm0, %v87_v2  ;;  %v90_v8 = vld.sshfl [vmem:[#allocation1 + $0x18] sm:$0xff pattern:$0x75316420]  ;;  %v89_v9 = vld.sshfl [vmem:[#allocation1 + $0x10] sm:$0xff pattern:$0x75316420] }
  0x16   :  { %1751 = vmatpush.msk.msra.mxu2 %vm116_vm0, %v87_v2  ;;  %1752 = vmatpush.msk.msra.mxu3 %vm116_vm0, %v87_v2  ;;  %v2167_v26 = vld [vmem:[#allocation5 + $0x198] sm:$0xff]  ;;  %v2169_v27 = vld [vmem:[#allocation5 + $0x190] sm:$0xff]  ;;  %v2171_v28 = vld [vmem:[#allocation5 + $0x160] sm:$0xff] }
  0x17   :  { %1691 = vmatmul.msk.f32.vlgmr.msra.gmra.mxu0 %vm91_vm1, %v62_v3  ;;  %1696 = vmatmul.msk.f32.vlgmr.msra.gmra.mxu1 %vm91_vm1, %v2093_v4  ;;  %v2174_v29 = vld [vmem:[#allocation5 + $0x148] sm:$0xff]  ;;  %v2179_v30 = vld [vmem:[#allocation5 + $0x178] sm:$0xff]  ;;  %v2181_v31 = vld [vmem:[#allocation5 + $0x170] sm:$0xff] }
  0x18   :  { %1697 = vmatmul.msk.f32.vlgmr.msra.gmra.mxu2 %vm91_vm1, %v2100_v5  ;;  %1698 = vmatmul.msk.f32.vlgmr.msra.gmra.mxu3 %vm91_vm1, %v2105_v6  ;;  %v64_v32 = vld [vmem:[%s3077_s0 + $0x10] sm:$0xff]  ;;  %v2190_v33 = vld [vmem:[#allocation5 + $0x140] sm:$0xff]  ;;  %v2198_v35 = vld [vmem:[#allocation5 + $0x158] sm:$0xff] }
  0x19   :  { %1699 = vmatpush.msk.msrb.mxu1 %vm116_vm0, %v88_v7  ;;  %1717 = vmatpush.msk.msrb.mxu3 %vm116_vm0, %v90_v8  ;;  %v2193_v34 = vld [vmem:[#allocation5 + $0x128] sm:$0xff]  ;;  %v2200_v36 = vld [vmem:[#allocation5 + $0x150] sm:$0xff]  ;;  %v2204_v37 = vld [vmem:[#allocation5 + $0x120] sm:$0xff] }
  0x1a   :  { %1708 = vmatpush.msk.msrb.mxu2 %vm116_vm0, %v89_v9  ;;  %394 = vmatpush.msrb.mxu0 %v2118_v11  ;;  %v2206_v38 = vld [vmem:[#allocation5 + $0x108] sm:$0xff]  ;;  %v2210_v39 = vld [vmem:[#allocation5 + $0x138] sm:$0xff]  ;;  %v2212_v40 = vld [vmem:[#allocation5 + $0x130] sm:$0xff] }
  0x1b   :  { %414 = vmatpush.msra.mxu1 %v2112_v10  ;;  %454 = vmatpush.msra.mxu3 %v2120_v12  ;;  %v2214_v41 = vld [vmem:[#allocation5 + $0x100] sm:$0xff]  ;;  %v2217_v42 = vld [vmem:[#allocation5 + $0xe8] sm:$0xff]  ;;  %v2222_v43 = vld [vmem:[#allocation5 + $0x118] sm:$0xff] }
  0x1c   :  { %434 = vmatpush.msra.mxu2 %v2126_v14  ;;  %395 = vmatpush.msrb.mxu0 %v2130_v15  ;;  %v2224_v44 = vld [vmem:[#allocation5 + $0x110] sm:$0xff]  ;;  %v2233_v46 = vld [vmem:[#allocation5 + $0xe0] sm:$0xff]  ;;  %v2236_v47 = vld [vmem:[#allocation5 + $0xc8] sm:$0xff] }
  0x1d   :  { %415 = vmatpush.msra.mxu1 %v2124_v13  ;;  %455 = vmatpush.msra.mxu3 %v2132_v16  ;;  %v65_v45 = vld [vmem:[%s3077_s0 + $0x18] sm:$0xff]  ;;  %v2241_v48 = vld [vmem:[#allocation5 + $0xf8] sm:$0xff]  ;;  %v2247_v50 = vld [vmem:[#allocation5 + $0xc0] sm:$0xff] }
  0x1e   :  { %435 = vmatpush.msra.mxu2 %v2138_v18  ;;  %396 = vmatpush.msrb.mxu0 %v2147_v20  ;;  %v2243_v49 = vld [vmem:[#allocation5 + $0xf0] sm:$0xff]  ;;  %v2249_v51 = vld [vmem:[#allocation5 + $0xa8] sm:$0xff]  ;;  %v2253_v52 = vld [vmem:[#allocation5 + $0xd8] sm:$0xff] }
  0x1f   :  { %416 = vmatpush.msra.mxu1 %v2136_v17  ;;  %1692 = vmatmul.msk.f32.gmra.mxu0 %vm91_vm1, %v63_v19  ;;  %3180 = vst [vmem:[#allocation14_spill] sm:$0xff] %v2249_v51  ;;  %v2255_v53 = vld [vmem:[#allocation5 + $0xd0] sm:$0xff]  ;;  %v2257_v54 = vld [vmem:[#allocation5 + $0xa0] sm:$0xff]  ;;  %v2260_v55 = vld [vmem:[#allocation5 + $0x88] sm:$0xff] }
  0x20   :  { %1700 = vmatmul.msk.f32.vlgmr.msrb.gmra.mxu1 %vm91_vm1, %v62_v3  ;;  %1709 = vmatmul.msk.f32.vlgmr.msrb.gmra.mxu2 %vm91_vm1, %v62_v3  ;;  %3181 = vst [vmem:[#allocation15_spill] sm:$0xff] %v2253_v52  ;;  %v2265_v56 = vld [vmem:[#allocation5 + $0xb8] sm:$0xff]  ;;  %v2267_v57 = vld [vmem:[#allocation5 + $0xb0] sm:$0xff]  ;;  %v2269_v58 = vld [vmem:[#allocation5 + $0x80] sm:$0xff] }
  0x21   :  { %1718 = vmatmul.msk.f32.vlgmr.msrb.gmra.mxu3 %vm91_vm1, %v62_v3  ;;  %417 = vmatpush.msra.mxu1 %v2150_v21  ;;  %3182 = vst [vmem:[#allocation16_spill] sm:$0xff] %v2257_v54  ;;  %v66_v59 = vld [vmem:[%s3077_s0 + $0x20] sm:$0xff]  ;;  %v2278_v60 = vld [vmem:[#allocation5 + $0x60] sm:$0xff]  ;;  %v2284_v61 = vld [vmem:[#allocation5 + $0x68] sm:$0xff] }
  0x22   :  { %456 = vmatpush.msra.mxu3 %v2155_v22  ;;  %436 = vmatpush.msra.mxu2 %v2157_v23  ;;  %3183 = vst [vmem:[#allocation17_spill] sm:$0xff] %v2260_v55  ;;  %v2286_v62 = vld [vmem:[#allocation5 + $0x98] sm:$0xff]  ;;  %v2290_v63 = vld [vmem:[#allocation5 + $0x40] sm:$0xff]  ;;  %v2292_v0 = vld [vmem:[#allocation5 + $0x90] sm:$0xff] }
  0x23   :  { %397 = vmatpush.msrb.mxu0 %v2161_v24  ;;  %418 = vmatpush.msra.mxu1 %v2163_v25  ;;  %3184 = vst [vmem:[#allocation18_spill] sm:$0xff] %v2265_v56  ;;  %v2296_v1 = vld [vmem:[#allocation5 + $0x48] sm:$0xff]  ;;  %v2298_v2 = vld [vmem:[#allocation5 + $0x78] sm:$0xff]  ;;  %v2300_v3 = vld [vmem:[#allocation5 + $0x20] sm:$0xff] }
  0x24   :  { %457 = vmatpush.msra.mxu3 %v2167_v26  ;;  %437 = vmatpush.msra.mxu2 %v2169_v27  ;;  %3185 = vst [vmem:[#allocation19_spill] sm:$0xff] %v2267_v57  ;;  %v2304_v7 = vld [vmem:[#allocation5 + $0x70] sm:$0xff]  ;;  %v2308_v8 = vld [vmem:[#allocation5 + $0x28] sm:$0xff]  ;;  %v2310_v9 = vld [vmem:[#allocation5 + $0x58] sm:$0xff] }
  0x25   :  { %398 = vmatpush.msrb.mxu0 %v2171_v28  ;;  %419 = vmatpush.msra.mxu1 %v2174_v29  ;;  %3186 = vst [vmem:[#allocation20_spill] sm:$0xff] %v2269_v58 }
  0x26   :  { %458 = vmatpush.msra.mxu3 %v2179_v30  ;;  %438 = vmatpush.msra.mxu2 %v2181_v31  ;;  %3187 = vst [vmem:[#allocation21_spill] sm:$0xff] %v2278_v60 }
  0x27   :  { %1693 = vmatmul.msk.f32.gmra.mxu0 %vm91_vm1, %v64_v32  ;;  %420 = vmatpush.msra.mxu1 %v2193_v34  ;;  %3188 = vst [vmem:[#allocation22_spill] sm:$0xff] %v2284_v61 }
  0x28   :  { %1701 = vmatmul.msk.f32.gmra.mxu1 %vm91_vm1, %v63_v19  ;;  %1710 = vmatmul.msk.f32.gmra.mxu2 %vm91_vm1, %v63_v19  ;;  %3189 = vst [vmem:[#allocation23_spill] sm:$0xff] %v2286_v62 }
  0x29   :  { %1719 = vmatmul.msk.f32.gmra.mxu3 %vm91_vm1, %v63_v19  ;;  %399 = vmatpush.msrb.mxu0 %v2190_v33  ;;  %3190 = vst [vmem:[#allocation24_spill] sm:$0xff] %v2290_v63  ;;  %v2312_v19 = vld [vmem:[#allocation5] sm:$0xff] }
  0x2a   :  { %459 = vmatpush.msra.mxu3 %v2198_v35  ;;  %439 = vmatpush.msra.mxu2 %v2200_v36  ;;  %3191 = vst [vmem:[#allocation25_spill] sm:$0xff] %v2292_v0 }
  0x2b   :  { %400 = vmatpush.msrb.mxu0 %v2204_v37  ;;  %421 = vmatpush.msra.mxu1 %v2206_v38  ;;  %3192 = vst [vmem:[#allocation26_spill] sm:$0xff] %v2296_v1 }
  0x2c   :  { %460 = vmatpush.msra.mxu3 %v2210_v39  ;;  %440 = vmatpush.msra.mxu2 %v2212_v40  ;;  %3193 = vst [vmem:[#allocation27_spill] sm:$0xff] %v2298_v2 }
  0x2d   :  { %401 = vmatpush.msrb.mxu0 %v2214_v41  ;;  %422 = vmatpush.msra.mxu1 %v2217_v42  ;;  %3194 = vst [vmem:[#allocation28_spill] sm:$0xff] %v2300_v3 }
  0x2e   :  { %461 = vmatpush.msra.mxu3 %v2222_v43  ;;  %441 = vmatpush.msra.mxu2 %v2224_v44  ;;  %3195 = vst [vmem:[#allocation29_spill] sm:$0xff] %v2304_v7 }
  0x2f   :  { %1694 = vmatmul.msk.f32.gmra.mxu0 %vm91_vm1, %v65_v45  ;;  %423 = vmatpush.msra.mxu1 %v2236_v47  ;;  %3196 = vst [vmem:[#allocation30_spill] sm:$0xff] %v2308_v8 }
  0x30   :  { %1702 = vmatmul.msk.f32.gmra.mxu1 %vm91_vm1, %v64_v32  ;;  %1711 = vmatmul.msk.f32.gmra.mxu2 %vm91_vm1, %v64_v32  ;;  %3197 = vst [vmem:[#allocation31_spill] sm:$0xff] %v2310_v9 }
  0x31   :  { %1720 = vmatmul.msk.f32.gmra.mxu3 %vm91_vm1, %v64_v32  ;;  %402 = vmatpush.msrb.mxu0 %v2233_v46  ;;  %3198 = vst [vmem:[#allocation32_spill] sm:$0xff] %v2312_v19  ;;  %v2320_v32 = vld [vmem:[#allocation5 + $0x50] sm:$0xff] }
  0x32   :  { %462 = vmatpush.msra.mxu3 %v2241_v48  ;;  %442 = vmatpush.msra.mxu2 %v2243_v49  ;;  %3199 = vst [vmem:[#allocation33_spill] sm:$0xff] %v2320_v32 }
  0x33   :  { %403 = vmatpush.msrb.mxu0 %v2247_v50  ;;  %424 = vmatpush.msra.mxu1 %v2249_v51 }
  0x34   :  { %463 = vmatpush.msra.mxu3 %v2253_v52  ;;  %443 = vmatpush.msra.mxu2 %v2255_v53 }
  0x35   :  { %404 = vmatpush.msrb.mxu0 %v2257_v54  ;;  %425 = vmatpush.msra.mxu1 %v2260_v55 }
  0x36   :  { %464 = vmatpush.msra.mxu3 %v2265_v56  ;;  %444 = vmatpush.msra.mxu2 %v2267_v57 }
  0x37   :  { %405 = vmatpush.msrb.mxu0 %v2269_v58  ;;  %426 = vmatpush.msra.mxu1 %v2284_v61 }
  0x38   :  { %1703 = vmatmul.msk.f32.gmra.mxu1 %vm91_vm1, %v65_v45  ;;  %1695 = vmatmul.msk.f32.gmra.mxu0 %vm91_vm1, %v66_v59 }
  0x39   :  { %1712 = vmatmul.msk.f32.gmra.mxu2 %vm91_vm1, %v65_v45  ;;  %1721 = vmatmul.msk.f32.gmra.mxu3 %vm91_vm1, %v65_v45  ;;  %v2324_v45 = vld [vmem:[#allocation5 + $0x8] sm:$0xff] }
  0x3a   :  { %406 = vmatpush.msrb.mxu0 %v2278_v60  ;;  %465 = vmatpush.msra.mxu3 %v2286_v62  ;;  %3200 = vst [vmem:[#allocation34_spill] sm:$0xff] %v2324_v45 }
  0x3b   :  { %445 = vmatpush.msra.mxu2 %v2292_v0  ;;  %427 = vmatpush.msra.mxu1 %v2296_v1  ;;  %v2038_v1 = vmov 0.0  }
  0x3c   :  { %407 = vmatpush.msrb.mxu0 %v2290_v63  ;;  %466 = vmatpush.msra.mxu3 %v2298_v2  ;;  %v2326_v63 = vld [vmem:[#allocation5 + $0x38] sm:$0xff] }
  0x3d   :  { %446 = vmatpush.msra.mxu2 %v2304_v7  ;;  %428 = vmatpush.msra.mxu1 %v2308_v8  ;;  %3201 = vst [vmem:[#allocation35_spill] sm:$0xff] %v2326_v63  ;;  %v2334_v8 = vld [vmem:[#allocation5 + $0x18] sm:$0xff] }
  0x3e   :  { %408 = vmatpush.msrb.mxu0 %v2300_v3  ;;  %467 = vmatpush.msra.mxu3 %v2310_v9  ;;  %v2330_v3 = vld [vmem:[#allocation5 + $0x30] sm:$0xff]  ;;  %3203 = vst [vmem:[#allocation37_spill] sm:$0xff] %v2334_v8 }
  0x3f   :  { %3202 = vst [vmem:[#allocation36_spill] sm:$0xff] %v2330_v3  ;;  %447 = vmatpush.msra.mxu2 %v2320_v32  ;;  %429 = vmatpush.msra.mxu1 %v2324_v45 }
  0x40   :  { %409 = vmatpush.msrb.mxu0 %v2312_v19  ;;  %1704 = vmatmul.msk.f32.gmra.mxu1 %vm91_vm1, %v66_v59  ;;  %v2338_v19 = vld [vmem:[#allocation5 + $0x10] sm:$0xff] }
  0x41   :  { %1713 = vmatmul.msk.f32.gmra.mxu2 %vm91_vm1, %v66_v59  ;;  %410 = vmatmul.f32.vlgmr.msrb.gmra.mxu0 %v2038_v1  ;;  %3204 = vst [vmem:[#allocation38_spill] sm:$0xff] %v2338_v19 }
  0x42   :  { %1722 = vmatmul.msk.f32.gmra.mxu3 %vm91_vm1, %v66_v59  ;;  %448 = vmatpush.msra.mxu2 %v2330_v3  ;;  %v3208_v59 = vld [vmem:[#allocation30_spill] sm:$0xff] }
  0x43   :  { %468 = vmatpush.msra.mxu3 %v2326_v63  ;;  %548 = vmatpush.msra.mxu0 %v2118_v11 }
  0x44   :  { %568 = vmatpush.msrb.mxu1 %v2112_v10  ;;  %449 = vmatpush.msra.mxu2 %v2338_v19 }
  0x45   :  { %469 = vmatpush.msra.mxu3 %v2334_v8  ;;  %549 = vmatpush.msra.mxu0 %v2130_v15 }
  0x46   :  { %588 = vmatpush.msrb.mxu2 %v2126_v14  ;;  %569 = vmatpush.msrb.mxu1 %v2124_v13 }
  0x47   :  { %608 = vmatpush.msrb.mxu3 %v2120_v12  ;;  %550 = vmatpush.msra.mxu0 %v2147_v20 }
  0x48   :  { %1705 = vmatmul.msk.f32.gmra.mxu1 %vm91_vm1, %v2093_v4  ;;  %589 = vmatpush.msrb.mxu2 %v2138_v18 }
  0x49   :  { %609 = vmatpush.msrb.mxu3 %v2132_v16  ;;  %1714 = vmatmul.msk.f32.gmra.mxu2 %vm91_vm1, %v2093_v4 }
  0x4a   :  { %1723 = vmatmul.msk.f32.gmra.mxu3 %vm91_vm1, %v2093_v4  ;;  %570 = vmatpush.msrb.mxu1 %v2136_v17  ;;  %v3205_v4 = vld [vmem:[#allocation24_spill] sm:$0xff] }
  0x4b   :  { %590 = vmatpush.msrb.mxu2 %v2157_v23  ;;  %610 = vmatpush.msrb.mxu3 %v2155_v22 }
  0x4c   :  { %551 = vmatpush.msra.mxu0 %v2161_v24  ;;  %571 = vmatpush.msrb.mxu1 %v2150_v21 }
  0x4d   :  { %591 = vmatpush.msrb.mxu2 %v2169_v27  ;;  %611 = vmatpush.msrb.mxu3 %v2167_v26 }
  0x4e   :  { %552 = vmatpush.msra.mxu0 %v2171_v28  ;;  %572 = vmatpush.msrb.mxu1 %v2163_v25 }
  0x4f   :  { %592 = vmatpush.msrb.mxu2 %v2181_v31  ;;  %612 = vmatpush.msrb.mxu3 %v2179_v30 }
  0x50   :  { %1706 = vmatmul.msk.f32.gmra.mxu1 %vm91_vm1, %v2100_v5  ;;  %553 = vmatpush.msra.mxu0 %v2190_v33 }
  0x51   :  { %1715 = vmatmul.msk.f32.gmra.mxu2 %vm91_vm1, %v2100_v5  ;;  %573 = vmatpush.msrb.mxu1 %v2174_v29 }
  0x52   :  { %1724 = vmatmul.msk.f32.gmra.mxu3 %vm91_vm1, %v2100_v5  ;;  %593 = vmatpush.msrb.mxu2 %v2200_v36  ;;  %v3206_v5 = vld [vmem:[#allocation26_spill] sm:$0xff] }
  0x53   :  { %613 = vmatpush.msrb.mxu3 %v2198_v35  ;;  %554 = vmatpush.msra.mxu0 %v2204_v37 }
  0x54   :  { %574 = vmatpush.msrb.mxu1 %v2193_v34  ;;  %594 = vmatpush.msrb.mxu2 %v2212_v40 }
  0x55   :  { %614 = vmatpush.msrb.mxu3 %v2210_v39  ;;  %555 = vmatpush.msra.mxu0 %v2214_v41 }
  0x56   :  { %575 = vmatpush.msrb.mxu1 %v2206_v38  ;;  %595 = vmatpush.msrb.mxu2 %v2224_v44 }
  0x57   :  { %615 = vmatpush.msrb.mxu3 %v2222_v43  ;;  %556 = vmatpush.msra.mxu0 %v2233_v46 }
  0x58   :  { %1707 = vmatmul.msk.f32.gmra.mxu1 %vm91_vm1, %v2105_v6  ;;  %596 = vmatpush.msrb.mxu2 %v2243_v49 }
  0x59   :  { %1716 = vmatmul.msk.f32.gmra.mxu2 %vm91_vm1, %v2105_v6  ;;  %576 = vmatpush.msrb.mxu1 %v2217_v42 }
  0x5a   :  { %1725 = vmatmul.msk.f32.gmra.mxu3 %vm91_vm1, %v2105_v6  ;;  %557 = vmatpush.msra.mxu0 %v2247_v50  ;;  %v3207_v6 = vld [vmem:[#allocation28_spill] sm:$0xff] }
  0x5b   :  { %616 = vmatpush.msrb.mxu3 %v2241_v48  ;;  %577 = vmatpush.msrb.mxu1 %v2236_v47 }
  0x5c   :  { %597 = vmatpush.msrb.mxu2 %v2255_v53  ;;  %558 = vmatpush.msra.mxu0 %v2257_v54 }
  0x5d   :  { %617 = vmatpush.msrb.mxu3 %v2253_v52  ;;  %578 = vmatpush.msrb.mxu1 %v2249_v51 }
  0x5e   :  { %598 = vmatpush.msrb.mxu2 %v2267_v57  ;;  %559 = vmatpush.msra.mxu0 %v2269_v58 }
  0x5f   :  { %618 = vmatpush.msrb.mxu3 %v2265_v56  ;;  %579 = vmatpush.msrb.mxu1 %v2260_v55 }
  0x60   :  { %430 = vmatmul.f32.vlgmr.msra.gmra.mxu1 %v2038_v1  ;;  %599 = vmatpush.msrb.mxu2 %v2292_v0 }
  0x61   :  { %450 = vmatmul.f32.vlgmr.msra.gmra.mxu2 %v2038_v1  ;;  %619 = vmatpush.msrb.mxu3 %v2286_v62 }
  0x62   :  { %470 = vmatmul.f32.vlgmr.msra.gmra.mxu3 %v2038_v1  ;;  %560 = vmatpush.msra.mxu0 %v2278_v60  ;;  %v3209_v1 = vld [vmem:[#allocation32_spill] sm:$0xff] }
  0x63   :  { %580 = vmatpush.msrb.mxu1 %v2284_v61  ;;  %600 = vmatpush.msrb.mxu2 %v2304_v7 }
  0x64   :  { %620 = vmatpush.msrb.mxu3 %v2298_v2  ;;  %561 = vmatpush.msra.mxu0 %v3205_v4 }
  0x65   :  { %581 = vmatpush.msrb.mxu1 %v3206_v5  ;;  %601 = vmatpush.msrb.mxu2 %v2320_v32 }
  0x66   :  { %621 = vmatpush.msrb.mxu3 %v2310_v9  ;;  %562 = vmatpush.msra.mxu0 %v3207_v6 }
  0x67   :  { %582 = vmatpush.msrb.mxu1 %v3208_v59  ;;  %602 = vmatpush.msrb.mxu2 %v2330_v3 }
  0x68   :  { %622 = vmatpush.msrb.mxu3 %v2326_v63  ;;  %563 = vmatpush.msra.mxu0 %v3209_v1 }
  0x69   :  { %583 = vmatpush.msrb.mxu1 %v2324_v45  ;;  %603 = vmatpush.msrb.mxu2 %v2338_v19 }
  0x6a   :  { %623 = vmatpush.msrb.mxu3 %v2334_v8  ;;  %702 = vmatpush.msrb.mxu0 %v2118_v11 }
  0x6b   :  { %722 = vmatpush.msra.mxu1 %v2112_v10  ;;  %742 = vmatpush.msra.mxu2 %v2126_v14 }
  0x6c   :  { %762 = vmatpush.msra.mxu3 %v2120_v12  ;;  %703 = vmatpush.msrb.mxu0 %v2130_v15 }
  0x6d   :  { %723 = vmatpush.msra.mxu1 %v2124_v13  ;;  %743 = vmatpush.msra.mxu2 %v2138_v18 }
  0x6e   :  { %763 = vmatpush.msra.mxu3 %v2132_v16  ;;  %704 = vmatpush.msrb.mxu0 %v2147_v20 }
  0x6f   :  { %724 = vmatpush.msra.mxu1 %v2136_v17  ;;  %744 = vmatpush.msra.mxu2 %v2157_v23 }
  0x70   :  { %764 = vmatpush.msra.mxu3 %v2155_v22  ;;  %705 = vmatpush.msrb.mxu0 %v2161_v24 }
  0x71   :  { %725 = vmatpush.msra.mxu1 %v2150_v21  ;;  %745 = vmatpush.msra.mxu2 %v2169_v27 }
  0x72   :  { %765 = vmatpush.msra.mxu3 %v2167_v26  ;;  %706 = vmatpush.msrb.mxu0 %v2171_v28 }
  0x73   :  { %726 = vmatpush.msra.mxu1 %v2163_v25  ;;  %746 = vmatpush.msra.mxu2 %v2181_v31 }
  0x74   :  { %766 = vmatpush.msra.mxu3 %v2179_v30  ;;  %707 = vmatpush.msrb.mxu0 %v2190_v33 }
  0x75   :  { %727 = vmatpush.msra.mxu1 %v2174_v29  ;;  %747 = vmatpush.msra.mxu2 %v2200_v36 }
  0x76   :  { %767 = vmatpush.msra.mxu3 %v2198_v35  ;;  %708 = vmatpush.msrb.mxu0 %v2204_v37 }
  0x77   :  { %728 = vmatpush.msra.mxu1 %v2193_v34  ;;  %748 = vmatpush.msra.mxu2 %v2212_v40 }
  0x78   :  { %768 = vmatpush.msra.mxu3 %v2210_v39  ;;  %709 = vmatpush.msrb.mxu0 %v2214_v41 }
  0x79   :  { %729 = vmatpush.msra.mxu1 %v2206_v38  ;;  %749 = vmatpush.msra.mxu2 %v2224_v44 }
  0x7a   :  { %769 = vmatpush.msra.mxu3 %v2222_v43  ;;  %710 = vmatpush.msrb.mxu0 %v2233_v46 }
  0x7b   :  { %730 = vmatpush.msra.mxu1 %v2217_v42  ;;  %750 = vmatpush.msra.mxu2 %v2243_v49 }
  0x7c   :  { %770 = vmatpush.msra.mxu3 %v2241_v48  ;;  %711 = vmatpush.msrb.mxu0 %v2247_v50 }
  0x7d   :  { %731 = vmatpush.msra.mxu1 %v2236_v47  ;;  %751 = vmatpush.msra.mxu2 %v2255_v53 }
  0x7e   :  { %771 = vmatpush.msra.mxu3 %v2253_v52  ;;  %712 = vmatpush.msrb.mxu0 %v2257_v54 }
  0x7f   :  { %732 = vmatpush.msra.mxu1 %v2249_v51  ;;  %752 = vmatpush.msra.mxu2 %v2267_v57 }
  0x80   :  { %772 = vmatpush.msra.mxu3 %v2265_v56  ;;  %713 = vmatpush.msrb.mxu0 %v2269_v58 }
  0x81   :  { %733 = vmatpush.msra.mxu1 %v2260_v55  ;;  %753 = vmatpush.msra.mxu2 %v2292_v0 }
  0x82   :  { %773 = vmatpush.msra.mxu3 %v2286_v62  ;;  %714 = vmatpush.msrb.mxu0 %v2278_v60 }
  0x83   :  { %734 = vmatpush.msra.mxu1 %v2284_v61  ;;  %754 = vmatpush.msra.mxu2 %v2304_v7 }
  0x84   :  { %774 = vmatpush.msra.mxu3 %v2298_v2  ;;  %715 = vmatpush.msrb.mxu0 %v3205_v4 }
  0x85   :  { %735 = vmatpush.msra.mxu1 %v3206_v5  ;;  %755 = vmatpush.msra.mxu2 %v2320_v32 }
  0x86   :  { %775 = vmatpush.msra.mxu3 %v2310_v9  ;;  %716 = vmatpush.msrb.mxu0 %v3207_v6  ;;  %v72_v9 = vld [vmem:[%s3079_s2] sm:$0xf] }
  0x87   :  { %736 = vmatpush.msra.mxu1 %v3208_v59  ;;  %756 = vmatpush.msra.mxu2 %v2330_v3  ;;  %v74_v32 = vperm.slane %v72_v9, 0 }
  0x88   :  { %776 = vmatpush.msra.mxu3 %v2326_v63  ;;  %717 = vmatpush.msrb.mxu0 %v3209_v1 }
  0x89   :  { %737 = vmatpush.msra.mxu1 %v2324_v45  ;;  %757 = vmatpush.msra.mxu2 %v2338_v19 }
  0x8a   :  { %777 = vmatpush.msra.mxu3 %v2334_v8  ;;  %v75_v8 = vperm.slane %v72_v9, 1 }
  0x94   :  { %v142_v6 = vpop.f32.mrf.mxu0  ;;  %v157_v5 = vpop.f32.mrf.mxu1 }
  0x95   :  { %v2495_v59 = vadd.f32 %v157_v5, %v74_v32 }
  0x97   :  { %3210 = vst [vmem:[#allocation39_spill] sm:$0xff] %v2495_v59  ;;  %v2511_v59 = vperm.slane %v72_v9, 2 }
  0x9b   :  { %v160_v3 = vpop.f32.mrf.mxu2  ;;  %v163_v4 = vpop.f32.mrf.mxu3 }
  0x9c   :  { %v2497_v63 = vadd.f32 %v160_v3, %v74_v32  ;;  %v2499_v1 = vadd.f32 %v163_v4, %v74_v32  ;;  %v145_v45 = vpop.f32.mrf.mxu0  ;;  %v77_v3 = vperm.slane %v72_v9, 3 }
  0x9d   :  { %v183_v2 = vpop.f32.mrf.mxu1  ;;  %v2501_v19 = vadd.f32 %v145_v45, %v74_v32 }
  0x9e   :  { %3211 = vst [vmem:[#allocation40_spill] sm:$0xff] %v2497_v63 }
  0x9f   :  { %3212 = vst [vmem:[#allocation41_spill] sm:$0xff] %v2499_v1 }
  0xa0   :  { %3213 = vst [vmem:[#allocation42_spill] sm:$0xff] %v2501_v19 }
  0xa3   :  { %v2503_v7 = vpop.f32.mrf.mxu2 }
  0xa4   :  { %v2505_v61 = vpop.f32.mrf.mxu3  ;;  %v148_v60 = vpop.f32.mrf.mxu0 }
  0xa5   :  { %v186_v62 = vpop.f32.mrf.mxu1  ;;  %v2507_v0 = vadd.f32 %v148_v60, %v74_v32 }
  0xa6   :  { %v2509_v5 = vadd.f32 %v186_v62, %v75_v8 }
  0xa7   :  { %3214 = vst [vmem:[#allocation43_spill] sm:$0xff] %v2507_v0 }
  0xa8   :  { %3215 = vst [vmem:[#allocation44_spill] sm:$0xff] %v2509_v5 }
  0xab   :  { %v227_v4 = vpop.f32.mrf.mxu2 }
  0xac   :  { %v268_v1 = vpop.f32.mrf.mxu3  ;;  %v2514_v63 = vadd.f32 %v227_v4, %v2511_v59  ;;  %v151_v19 = vpop.f32.mrf.mxu0 }
  0xad   :  { %v2516_v45 = vadd.f32 %v268_v1, %v77_v3  ;;  %v189_v55 = vpop.f32.mrf.mxu1  ;;  %v2518_v58 = vadd.f32 %v151_v19, %v74_v32 }
  0xae   :  { %3216 = vst [vmem:[#allocation45_spill] sm:$0xff] %v2514_v63  ;;  %v2520_v56 = vadd.f32 %v189_v55, %v75_v8 }
  0xaf   :  { %3217 = vst [vmem:[#allocation46_spill] sm:$0xff] %v2516_v45 }
  0xb0   :  { %3218 = vst [vmem:[#allocation47_spill] sm:$0xff] %v2518_v58 }
  0xb1   :  { %3219 = vst [vmem:[#allocation48_spill] sm:$0xff] %v2520_v56 }
  0xb3   :  { %v230_v60 = vpop.f32.mrf.mxu2 }
  0xb4   :  { %v271_v0 = vpop.f32.mrf.mxu3  ;;  %v2523_v62 = vadd.f32 %v230_v60, %v2511_v59 }
  0xb5   :  { %v2525_v5 = vadd.f32 %v271_v0, %v77_v3  ;;  %v192_v9 = vpop.f32.mrf.mxu1  ;;  %v154_v57 = vpop.f32.mrf.mxu0 }
  0xb6   :  { %3220 = vst [vmem:[#allocation49_spill] sm:$0xff] %v2523_v62  ;;  %v2527_v51 = vadd.f32 %v192_v9, %v75_v8  ;;  %v2529_v4 = vadd.f32 %v154_v57, %v74_v32 }
  0xb7   :  { %3221 = vst [vmem:[#allocation50_spill] sm:$0xff] %v2525_v5 }
  0xb8   :  { %3222 = vst [vmem:[#allocation51_spill] sm:$0xff] %v2527_v51  ;;  %v143_v51 = vadd.f32 %v142_v6, %v74_v32 }
  0xb9   :  { %3223 = vst [vmem:[#allocation52_spill] sm:$0xff] %v2529_v4 }
  0xbc   :  { %v233_v1 = vpop.f32.mrf.mxu2  ;;  %v274_v19 = vpop.f32.mrf.mxu3 }
  0xbd   :  { %v2532_v63 = vadd.f32 %v233_v1, %v2511_v59  ;;  %v195_v55 = vpop.f32.mrf.mxu1  ;;  %v2534_v58 = vadd.f32 %v274_v19, %v77_v3 }
  0xbe   :  { %v2536_v56 = vadd.f32 %v195_v55, %v75_v8  ;;  %v411_v4 = vpop.f32.mrf.mxu0 }
  0xbf   :  { %3224 = vst [vmem:[#allocation53_spill] sm:$0xff] %v2532_v63  ;;  %v474_v1 = vadd.f32 %v411_v4, %v143_v51  ;;  %v184_v4 = vadd.f32 %v183_v2, %v75_v8 }
  0xc0   :  { %3225 = vst [vmem:[#allocation54_spill] sm:$0xff] %v2534_v58 }
  0xc1   :  { %3226 = vst [vmem:[#allocation55_spill] sm:$0xff] %v2536_v56  ;;  %v1726_v56 = vmul.f32 -1.442695, %v474_v1 }
  0xc3   :  { %1762 = vpow2.f32 %v1726_v56 }
  0xc4   :  { %v236_v60 = vpop.f32.mrf.mxu2 }
  0xc5   :  { %v2539_v0 = vadd.f32 %v236_v60, %v2511_v59  ;;  %v277_v62 = vpop.f32.mrf.mxu3  ;;  %v198_v5 = vpop.f32.mrf.mxu1 }
  0xc6   :  { %v2541_v9 = vadd.f32 %v277_v62, %v77_v3  ;;  %v2543_v57 = vadd.f32 %v198_v5, %v75_v8 }
  0xc7   :  { %3227 = vst [vmem:[#allocation56_spill] sm:$0xff] %v2539_v0 }
  0xc8   :  { %3228 = vst [vmem:[#allocation57_spill] sm:$0xff] %v2541_v9 }
  0xc9   :  { %3229 = vst [vmem:[#allocation58_spill] sm:$0xff] %v2543_v57 }
  0xcc   :  { %v239_v63 = vpop.f32.mrf.mxu2 }
  0xcd   :  { %v2546_v45 = vadd.f32 %v239_v63, %v2511_v59  ;;  %v280_v19 = vpop.f32.mrf.mxu3  ;;  %v201_v55 = vpop.f32.mrf.mxu1 }
  0xce   :  { %v2548_v58 = vadd.f32 %v280_v19, %v77_v3  ;;  %v2550_v60 = vadd.f32 %v201_v55, %v75_v8  ;;  %v1763_v63 = vpop.eup %1762 }
  0xcf   :  { %3230 = vst [vmem:[#allocation59_spill] sm:$0xff] %v2546_v45  ;;  %v484_v6 = vadd.f32 1.0, %v1763_v63 }
  0xd0   :  { %3231 = vst [vmem:[#allocation60_spill] sm:$0xff] %v2548_v58 }
  0xd1   :  { %3232 = vst [vmem:[#allocation61_spill] sm:$0xff] %v2550_v60  ;;  %1764 = vrcp.f32 %v484_v6  ;;  %vm491_vm3 = vweird.f32 %v484_v6 }
  0xd4   :  { %v242_v0 = vpop.f32.mrf.mxu2 }
  0xd5   :  { %v2553_v62 = vadd.f32 %v242_v0, %v2511_v59  ;;  %v283_v5 = vpop.f32.mrf.mxu3  ;;  %v204_v57 = vpop.f32.mrf.mxu1 }
  0xd6   :  { %v2555_v32 = vadd.f32 %v283_v5, %v77_v3  ;;  %v2557_v51 = vadd.f32 %v204_v57, %v75_v8  ;;  %v266_v5 = vadd.f32 %v2505_v61, %v77_v3 }
  0xd7   :  { %3233 = vst [vmem:[#allocation62_spill] sm:$0xff] %v2553_v62  ;;  %v1765_v62 = vpop.eup %1764 }
  0xd8   :  { %3234 = vst [vmem:[#allocation63_spill] sm:$0xff] %v2555_v32  ;;  %v487_v63 = vmul.f32 %v1765_v62, %v484_v6  ;;  %vm492_vm2 = vweird.f32 %v1765_v62 }
  0xd9   :  { %3235 = vst [vmem:[#allocation64_spill] sm:$0xff] %v2557_v51  ;;  %vm493_vm5 = vmor %vm491_vm3, %vm492_vm2 }
  0xdc   :  { %v245_v45 = vpop.f32.mrf.mxu2 }
  0xdd   :  { %v2560_v1 = vadd.f32 %v245_v45, %v2511_v59  ;;  %v286_v19 = vpop.f32.mrf.mxu3  ;;  %v431_v55 = vpop.f32.mrf.mxu1 }
  0xde   :  { %v2562_v56 = vadd.f32 %v286_v19, %v77_v3  ;;  %v475_v60 = vadd.f32 %v431_v55, %v184_v4  ;;  %v225_v19 = vadd.f32 %v2503_v7, %v2511_v59 }
  0xdf   :  { %3236 = vst [vmem:[#allocation65_spill] sm:$0xff] %v2560_v1  ;;  %v488_v1 = vsub.f32 1.0, %v487_v63 }
  0xe0   :  { %3237 = vst [vmem:[#allocation66_spill] sm:$0xff] %v2562_v56  ;;  %v1727_v0 = vmul.f32 -1.442695, %v475_v60 }
  0xe1   :  { %v489_v60 = vmul.f32 %v1765_v62, %v488_v1 }
  0xe2   :  { %1766 = vpow2.f32 %v1727_v0 }
  0xe4   :  { %v451_v45 = vpop.f32.mrf.mxu2 }
  0xe5   :  { %v471_v57 = vpop.f32.mrf.mxu3  ;;  %v476_v4 = vadd.f32 %v451_v45, %v225_v19 }
  0xe6   :  { %v477_v51 = vadd.f32 %v471_v57, %v266_v5  ;;  %v490_v5 = vadd.f32 %v1765_v62, %v489_v60 }
  0xe8   :  { %v1767_v32 = vpop.eup %1766  ;;  %v1728_v2 = vmul.f32 -1.442695, %v477_v51  ;;  %v494_v59 = vsel %vm493_vm5, %v1765_v62, %v490_v5 }
  0xe9   :  { %v485_v8 = vadd.f32 1.0, %v1767_v32  ;;  %v497_v32 = vand.u32 2147483648, %v484_v6 }
  0xea   :  { %1768 = vpow2.f32 %v1728_v2  ;;  %v495_v2 = vand.u32 2147483647, %v484_v6 }
  0xeb   :  { %1770 = vrcp.f32 %v485_v8  ;;  %v512_v51 = vand.u32 2147483648, %v485_v8  ;;  %v510_v58 = vand.u32 2147483647, %v485_v8  ;;  %vm506_vm6 = vweird.f32 %v485_v8 }
  0xec   :  { %1772 = vtanh.f32 %v476_v4  ;;  %v498_v19 = vor.u32 1.1754944e-38, %v497_v32  ;;  %vm496_vm8 = vcmp.eq.f32.partialorder %v495_v2, 8.507059e+37 }
  0xed   :  { %v513_v45 = vor.u32 1.1754944e-38, %v512_v51  ;;  %vm511_vm9 = vcmp.eq.f32.partialorder %v510_v58, 8.507059e+37 }
  0xee   :  { %v499_v60 = vsel %vm496_vm8, %v498_v19, %v494_v59 }
  0xf0   :  { %v1769_v55 = vpop.eup %1768 }
  0xf1   :  { %v1771_v0 = vpop.eup %1770  ;;  %v523_v56 = vadd.f32 1.0, %v1769_v55 }
  0xf2   :  { %v502_v61 = vmul.f32 %v1771_v0, %v485_v8  ;;  %vm507_vm4 = vweird.f32 %v1771_v0  ;;  %v1773_v7 = vpop.eup %1772 }
  0xf3   :  { %1774 = vrcp.f32 %v523_v56  ;;  %vm508_vm7 = vmor %vm506_vm6, %vm507_vm4  ;;  %v535_v8 = vand.u32 2147483648, %v523_v56  ;;  %vm529_vm11 = vweird.f32 %v523_v56  ;;  %v533_v5 = vand.u32 2147483647, %v523_v56 }
  0xf4   :  { %v503_v3 = vsub.f32 1.0, %v502_v61 }
  0xf5   :  { %vm534_vm13 = vcmp.eq.f32.partialorder %v533_v5, 8.507059e+37 }
  0xf6   :  { %v504_v57 = vmul.f32 %v1771_v0, %v503_v3  ;;  %v518_v3 = vmul.f32 %v1773_v7, %v499_v60 }
  0xf8   :  { %v505_v1 = vadd.f32 %v1771_v0, %v504_v57 }
  0xf9   :  { %v1775_v63 = vpop.eup %1774 }
  0xfa   :  { %v509_v4 = vsel %vm508_vm7, %v1771_v0, %v505_v1  ;;  %v525_v55 = vmul.f32 %v1775_v63, %v523_v56  ;;  %vm530_vm10 = vweird.f32 %v1775_v63  ;;  %v536_v0 = vor.u32 1.1754944e-38, %v535_v8  ;;  %v3266_v1 = vld [vmem:[#allocation45_spill] sm:$0xff] }
  0xfb   :  { %v514_v61 = vsel %vm511_vm9, %v513_v45, %v509_v4  ;;  %vm531_vm12 = vmor %vm529_vm11, %vm530_vm10 }
  0xfc   :  { %v517_v9 = vmul.f32 0.0, %v514_v61  ;;  %v526_v6 = vsub.f32 1.0, %v525_v55 }
  0xfe   :  { %v2567_v54 = vadd.f32 %v518_v3, %v517_v9  ;;  %v527_v52 = vmul.f32 %v1775_v63, %v526_v6 }
 0x100   :  { %1776 = vtanh.f32 %v2567_v54  ;;  %v528_v62 = vadd.f32 %v1775_v63, %v527_v52 }
 0x102   :  { %v532_v51 = vsel %vm531_vm12, %v1775_v63, %v528_v62 }
 0x103   :  { %v537_v32 = vsel %vm534_vm13, %v536_v0, %v532_v51 }
 0x106   :  { %v1777_v58 = vpop.eup %1776 }
 0x107   :  { %v540_v57 = vmul.f32 %v1777_v58, %v537_v32 }
 0x109   :  { %564 = vmatmul.f32.vlgmr.msra.gmra.mxu0 %v540_v57  ;;  %584 = vmatmul.f32.vlgmr.msrb.gmra.mxu1 %v540_v57 }
 0x10a   :  { %604 = vmatmul.f32.vlgmr.msrb.gmra.mxu2 %v540_v57  ;;  %624 = vmatmul.f32.vlgmr.msrb.gmra.mxu3 %v540_v57 }
 0x10b   :  { %856 = vmatpush.msra.mxu0 %v2118_v11  ;;  %876 = vmatpush.msrb.mxu1 %v2112_v10  ;;  %v3238_v10 = vld [vmem:[#allocation15_spill] sm:$0xff]  ;;  %v3239_v11 = vld [vmem:[#allocation16_spill] sm:$0xff] }
 0x10c   :  { %896 = vmatpush.msrb.mxu2 %v2126_v14  ;;  %916 = vmatpush.msrb.mxu3 %v2120_v12  ;;  %v3240_v12 = vld [vmem:[#allocation14_spill] sm:$0xff] }
 0x10d   :  { %857 = vmatpush.msra.mxu0 %v2130_v15  ;;  %877 = vmatpush.msrb.mxu1 %v2124_v13  ;;  %v3241_v13 = vld [vmem:[#allocation19_spill] sm:$0xff]  ;;  %v3242_v14 = vld [vmem:[#allocation18_spill] sm:$0xff]  ;;  %v3243_v15 = vld [vmem:[#allocation20_spill] sm:$0xff] }
 0x10e   :  { %897 = vmatpush.msrb.mxu2 %v2138_v18  ;;  %917 = vmatpush.msrb.mxu3 %v2132_v16  ;;  %v3244_v16 = vld [vmem:[#allocation17_spill] sm:$0xff]  ;;  %v3246_v18 = vld [vmem:[#allocation23_spill] sm:$0xff] }
 0x10f   :  { %858 = vmatpush.msra.mxu0 %v2147_v20  ;;  %878 = vmatpush.msrb.mxu1 %v2136_v17  ;;  %v3245_v17 = vld [vmem:[#allocation25_spill] sm:$0xff] }
 0x110   :  { %898 = vmatpush.msrb.mxu2 %v2157_v23  ;;  %918 = vmatpush.msrb.mxu3 %v2155_v22  ;;  %v3247_v20 = vld [vmem:[#allocation21_spill] sm:$0xff]  ;;  %v3250_v23 = vld [vmem:[#allocation27_spill] sm:$0xff] }
 0x111   :  { %859 = vmatpush.msra.mxu0 %v2161_v24  ;;  %879 = vmatpush.msrb.mxu1 %v2150_v21  ;;  %v3248_v21 = vld [vmem:[#allocation22_spill] sm:$0xff]  ;;  %v3249_v22 = vld [vmem:[#allocation29_spill] sm:$0xff]  ;;  %v3251_v24 = vld [vmem:[#allocation24_spill] sm:$0xff] }
 0x112   :  { %899 = vmatpush.msrb.mxu2 %v2169_v27  ;;  %919 = vmatpush.msrb.mxu3 %v2167_v26  ;;  %v3253_v26 = vld [vmem:[#allocation33_spill] sm:$0xff]  ;;  %v3254_v27 = vld [vmem:[#allocation31_spill] sm:$0xff] }
 0x113   :  { %860 = vmatpush.msra.mxu0 %v2171_v28  ;;  %880 = vmatpush.msrb.mxu1 %v2163_v25  ;;  %v3252_v25 = vld [vmem:[#allocation26_spill] sm:$0xff]  ;;  %v3255_v28 = vld [vmem:[#allocation28_spill] sm:$0xff] }
 0x114   :  { %900 = vmatpush.msrb.mxu2 %v2181_v31  ;;  %920 = vmatpush.msrb.mxu3 %v2179_v30  ;;  %v3257_v30 = vld [vmem:[#allocation36_spill] sm:$0xff]  ;;  %v3258_v31 = vld [vmem:[#allocation35_spill] sm:$0xff] }
 0x115   :  { %861 = vmatpush.msra.mxu0 %v2190_v33  ;;  %881 = vmatpush.msrb.mxu1 %v2174_v29  ;;  %v3256_v29 = vld [vmem:[#allocation30_spill] sm:$0xff]  ;;  %v3259_v33 = vld [vmem:[#allocation32_spill] sm:$0xff] }
 0x116   :  { %901 = vmatpush.msrb.mxu2 %v2200_v36  ;;  %921 = vmatpush.msrb.mxu3 %v2198_v35  ;;  %v3261_v35 = vld [vmem:[#allocation38_spill] sm:$0xff]  ;;  %v3262_v36 = vld [vmem:[#allocation37_spill] sm:$0xff] }
 0x117   :  { %862 = vmatpush.msra.mxu0 %v2204_v37  ;;  %882 = vmatpush.msrb.mxu1 %v2193_v34  ;;  %v3260_v34 = vld [vmem:[#allocation34_spill] sm:$0xff] }
 0x118   :  { %902 = vmatpush.msrb.mxu2 %v2212_v40  ;;  %922 = vmatpush.msrb.mxu3 %v2210_v39  ;;  %v3263_v39 = vld [vmem:[#allocation42_spill] sm:$0xff] }
 0x119   :  { %863 = vmatpush.msra.mxu0 %v2214_v41  ;;  %883 = vmatpush.msrb.mxu1 %v2206_v38  ;;  %v3264_v41 = vld [vmem:[#allocation44_spill] sm:$0xff] }
 0x11a   :  { %903 = vmatpush.msrb.mxu2 %v2224_v44  ;;  %923 = vmatpush.msrb.mxu3 %v2222_v43 }
 0x11b   :  { %864 = vmatpush.msra.mxu0 %v2233_v46  ;;  %884 = vmatpush.msrb.mxu1 %v2217_v42 }
 0x11c   :  { %904 = vmatpush.msrb.mxu2 %v2243_v49  ;;  %924 = vmatpush.msrb.mxu3 %v2241_v48 }
 0x11d   :  { %865 = vmatpush.msra.mxu0 %v2247_v50  ;;  %885 = vmatpush.msrb.mxu1 %v2236_v47  ;;  %v3265_v47 = vld [vmem:[#allocation46_spill] sm:$0xff] }
 0x11e   :  { %905 = vmatpush.msrb.mxu2 %v2255_v53  ;;  %925 = vmatpush.msrb.mxu3 %v3238_v10 }
 0x11f   :  { %866 = vmatpush.msra.mxu0 %v3239_v11  ;;  %886 = vmatpush.msrb.mxu1 %v3240_v12 }
 0x120   :  { %906 = vmatpush.msrb.mxu2 %v3241_v13  ;;  %926 = vmatpush.msrb.mxu3 %v3242_v14 }
 0x121   :  { %867 = vmatpush.msra.mxu0 %v3243_v15  ;;  %887 = vmatpush.msrb.mxu1 %v3244_v16 }
 0x122   :  { %907 = vmatpush.msrb.mxu2 %v3245_v17  ;;  %927 = vmatpush.msrb.mxu3 %v3246_v18 }
 0x123   :  { %868 = vmatpush.msra.mxu0 %v3247_v20  ;;  %888 = vmatpush.msrb.mxu1 %v3248_v21 }
 0x124   :  { %908 = vmatpush.msrb.mxu2 %v3249_v22  ;;  %928 = vmatpush.msrb.mxu3 %v3250_v23 }
 0x125   :  { %869 = vmatpush.msra.mxu0 %v3251_v24  ;;  %889 = vmatpush.msrb.mxu1 %v3252_v25 }
 0x126   :  { %909 = vmatpush.msrb.mxu2 %v3253_v26  ;;  %929 = vmatpush.msrb.mxu3 %v3254_v27 }
 0x127   :  { %870 = vmatpush.msra.mxu0 %v3255_v28  ;;  %890 = vmatpush.msrb.mxu1 %v3256_v29 }
 0x128   :  { %910 = vmatpush.msrb.mxu2 %v3257_v30  ;;  %930 = vmatpush.msrb.mxu3 %v3258_v31 }
 0x129   :  { %871 = vmatpush.msra.mxu0 %v3259_v33  ;;  %891 = vmatpush.msrb.mxu1 %v3260_v34 }
 0x12a   :  { %911 = vmatpush.msrb.mxu2 %v3261_v35  ;;  %931 = vmatpush.msrb.mxu3 %v3262_v36 }
 0x186   :  { %v565_v37 = vpop.f32.mrf.mxu0  ;;  %v585_v38 = vpop.f32.mrf.mxu1 }
 0x187   :  { %v628_v40 = vadd.f32 %v565_v37, %v3263_v39  ;;  %v629_v42 = vadd.f32 %v585_v38, %v3264_v41  ;;  %v2645_v41 = vld [vmem:[#allocation5 + $0x1e8] sm:$0xff] }
 0x189   :  { %v1729_v43 = vmul.f32 -1.442695, %v628_v40  ;;  %v1730_v44 = vmul.f32 -1.442695, %v629_v42  ;;  %v2648_v42 = vld [vmem:[#allocation5 + $0x1f0] sm:$0xff] }
 0x18b   :  { %1778 = vpow2.f32 %v1729_v43  ;;  %v2651_v43 = vld [vmem:[#allocation5 + $0x1f8] sm:$0xff] }
 0x18c   :  { %1780 = vpow2.f32 %v1730_v44  ;;  %v2654_v44 = vld [vmem:[#allocation5 + $0x1c0] sm:$0xff] }
 0x18d   :  { %v625_v46 = vpop.f32.mrf.mxu3  ;;  %v605_v56 = vpop.f32.mrf.mxu2 }
 0x18e   :  { %v631_v48 = vadd.f32 %v625_v46, %v3265_v47  ;;  %v630_v63 = vadd.f32 %v605_v56, %v3266_v1  ;;  %v2657_v46 = vld [vmem:[#allocation5 + $0x1c8] sm:$0xff]  ;;  %v2660_v47 = vld [vmem:[#allocation5 + $0x1d0] sm:$0xff] }
 0x18f   :  { %v2681_v56 = vld [vmem:[#allocation5 + $0x188] sm:$0xff] }
 0x190   :  { %v1731_v49 = vmul.f32 -1.442695, %v631_v48  ;;  %v2663_v48 = vld [vmem:[#allocation5 + $0x1d8] sm:$0xff]  ;;  %v2693_v1 = vld [vmem:[#allocation5 + $0x168] sm:$0xff] }
 0x191   :  { %v1779_v50 = vpop.eup %1778 }
 0x192   :  { %v1781_v52 = vpop.eup %1780  ;;  %v638_v53 = vadd.f32 1.0, %v1779_v50  ;;  %1782 = vpow2.f32 %v1731_v49  ;;  %v2666_v49 = vld [vmem:[#allocation5 + $0x1a0] sm:$0xff]  ;;  %v2669_v50 = vld [vmem:[#allocation5 + $0x1a8] sm:$0xff] }
 0x193   :  { %v639_v9 = vadd.f32 1.0, %v1781_v52  ;;  %v2672_v52 = vld [vmem:[#allocation5 + $0x1b0] sm:$0xff] }
 0x194   :  { %1784 = vrcp.f32 %v638_v53  ;;  %v651_v61 = vand.u32 2147483648, %v638_v53  ;;  %v649_v62 = vand.u32 2147483647, %v638_v53  ;;  %vm645_vm0 = vweird.f32 %v638_v53 }
 0x195   :  { %1786 = vrcp.f32 %v639_v9  ;;  %v666_v3 = vand.u32 2147483648, %v639_v9  ;;  %v664_v5 = vand.u32 2147483647, %v639_v9  ;;  %vm660_vm1 = vweird.f32 %v639_v9 }
 0x196   :  { %v652_v58 = vor.u32 1.1754944e-38, %v651_v61  ;;  %vm650_vm4 = vcmp.eq.f32.partialorder %v649_v62, 8.507059e+37  ;;  %v2714_v61 = vld [vmem:[#allocation5 + $0x120] sm:$0xff]  ;;  %v2723_v62 = vld [vmem:[#allocation5 + $0x138] sm:$0xff] }
 0x197   :  { %v667_v10 = vor.u32 1.1754944e-38, %v666_v3  ;;  %vm665_vm5 = vcmp.eq.f32.partialorder %v664_v5, 8.507059e+37  ;;  %v2717_v3 = vld [vmem:[#allocation5 + $0x128] sm:$0xff] }
 0x198   :  { %v1783_v2 = vpop.eup %1782  ;;  %v2729_v5 = vld [vmem:[#allocation5 + $0x108] sm:$0xff] }
 0x199   :  { %v677_v7 = vadd.f32 1.0, %v1783_v2  ;;  %v2684_v2 = vld [vmem:[#allocation5 + $0x190] sm:$0xff] }
 0x19a   :  { %v1785_v59 = vpop.eup %1784 }
 0x19b   :  { %v1787_v45 = vpop.eup %1786  ;;  %v641_v19 = vmul.f32 %v1785_v59, %v638_v53  ;;  %1788 = vrcp.f32 %v677_v7  ;;  %vm646_vm14 = vweird.f32 %v1785_v59  ;;  %v689_v25 = vand.u32 2147483648, %v677_v7  ;;  %v2675_v53 = vld [vmem:[#allocation5 + $0x1b8] sm:$0xff] }
 0x19c   :  { %v656_v4 = vmul.f32 %v1787_v45, %v639_v9  ;;  %1790 = vtanh.f32 %v630_v63  ;;  %vm661_vm15 = vweird.f32 %v1787_v45  ;;  %vm647_vm2 = vmor %vm645_vm0, %vm646_vm14  ;;  %vm683_vm7 = vweird.f32 %v677_v7  ;;  %v2678_v9 = vld [vmem:[#allocation5 + $0x180] sm:$0xff]  ;;  %v2696_v63 = vld [vmem:[#allocation5 + $0x170] sm:$0xff] }
 0x19d   :  { %v642_v55 = vsub.f32 1.0, %v641_v19  ;;  %vm662_vm3 = vmor %vm660_vm1, %vm661_vm15  ;;  %v687_v28 = vand.u32 2147483647, %v677_v7  ;;  %v690_v37 = vor.u32 1.1754944e-38, %v689_v25  ;;  %v2702_v19 = vld [vmem:[#allocation5 + $0x140] sm:$0xff]  ;;  %v2781_v25 = vld [vmem:[#allocation5 + $0x98] sm:$0xff] }
 0x19e   :  { %v657_v60 = vsub.f32 1.0, %v656_v4  ;;  %v2705_v4 = vld [vmem:[#allocation5 + $0x148] sm:$0xff]  ;;  %3275 = vst [vmem:[#allocation23_spill] sm:$0xff] %v2781_v25 }
 0x19f   :  { %v643_v6 = vmul.f32 %v1785_v59, %v642_v55  ;;  %vm688_vm9 = vcmp.eq.f32.partialorder %v687_v28, 8.507059e+37  ;;  %v2708_v55 = vld [vmem:[#allocation5 + $0x150] sm:$0xff]  ;;  %v2784_v28 = vld [vmem:[#allocation5 + $0x60] sm:$0xff] }
 0x1a0   :  { %v658_v8 = vmul.f32 %v1787_v45, %v657_v60  ;;  %v2711_v60 = vld [vmem:[#allocation5 + $0x158] sm:$0xff]  ;;  %3276 = vst [vmem:[#allocation21_spill] sm:$0xff] %v2784_v28 }
 0x1a1   :  { %v1789_v51 = vpop.eup %1788  ;;  %v644_v0 = vadd.f32 %v1785_v59, %v643_v6  ;;  %v2720_v6 = vld [vmem:[#allocation5 + $0x130] sm:$0xff] }
 0x1a2   :  { %v659_v32 = vadd.f32 %v1787_v45, %v658_v8  ;;  %v679_v57 = vmul.f32 %v1789_v51, %v677_v7  ;;  %v1791_v12 = vpop.eup %1790  ;;  %vm684_vm6 = vweird.f32 %v1789_v51  ;;  %v2687_v7 = vld [vmem:[#allocation5 + $0x198] sm:$0xff]  ;;  %v2726_v8 = vld [vmem:[#allocation5 + $0x100] sm:$0xff] }
 0x1a3   :  { %v648_v11 = vsel %vm647_vm2, %v1785_v59, %v644_v0  ;;  %vm685_vm8 = vmor %vm683_vm7, %vm684_vm6  ;;  %v2690_v59 = vld [vmem:[#allocation5 + $0x160] sm:$0xff]  ;;  %v2735_v0 = vld [vmem:[#allocation5 + $0x118] sm:$0xff] }
 0x1a4   :  { %v653_v13 = vsel %vm650_vm4, %v652_v58, %v648_v11  ;;  %v663_v14 = vsel %vm662_vm3, %v1787_v45, %v659_v32  ;;  %v680_v15 = vsub.f32 1.0, %v679_v57  ;;  %v2699_v45 = vld [vmem:[#allocation5 + $0x178] sm:$0xff]  ;;  %v2738_v58 = vld [vmem:[#allocation5 + $0xe0] sm:$0xff]  ;;  %v2741_v32 = vld [vmem:[#allocation5 + $0xe8] sm:$0xff] }
 0x1a5   :  { %v668_v16 = vsel %vm665_vm5, %v667_v10, %v663_v14  ;;  %v672_v18 = vmul.f32 %v1791_v12, %v653_v13  ;;  %v2744_v57 = vld [vmem:[#allocation5 + $0xf0] sm:$0xff]  ;;  %v2747_v10 = vld [vmem:[#allocation5 + $0xf8] sm:$0xff]  ;;  %v2750_v11 = vld [vmem:[#allocation5 + $0xc0] sm:$0xff] }
 0x1a6   :  { %v671_v20 = vmul.f32 %v668_v16, %v2567_v54  ;;  %v681_v21 = vmul.f32 %v1789_v51, %v680_v15  ;;  %v2642_v54 = vld [vmem:[#allocation5 + $0x1e0] sm:$0xff]  ;;  %v2753_v12 = vld [vmem:[#allocation5 + $0xc8] sm:$0xff]  ;;  %v2756_v13 = vld [vmem:[#allocation5 + $0xd0] sm:$0xff] }
 0x1a7   :  { %3267 = vst [vmem:[#allocation15_spill] sm:$0xff] %v2756_v13  ;;  %v2759_v14 = vld [vmem:[#allocation5 + $0xd8] sm:$0xff]  ;;  %v2762_v15 = vld [vmem:[#allocation5 + $0xa0] sm:$0xff]  ;;  %v2765_v16 = vld [vmem:[#allocation5 + $0xa8] sm:$0xff] }
 0x1a8   :  { %v2639_v23 = vadd.f32 %v672_v18, %v671_v20  ;;  %v682_v24 = vadd.f32 %v1789_v51, %v681_v21  ;;  %3268 = vst [vmem:[#allocation16_spill] sm:$0xff] %v2759_v14  ;;  %v2768_v18 = vld [vmem:[#allocation5 + $0xb0] sm:$0xff]  ;;  %v2771_v20 = vld [vmem:[#allocation5 + $0xb8] sm:$0xff]  ;;  %v2774_v21 = vld [vmem:[#allocation5 + $0x80] sm:$0xff] }
 0x1a9   :  { %3269 = vst [vmem:[#allocation14_spill] sm:$0xff] %v2762_v15 }
 0x1aa   :  { %1792 = vtanh.f32 %v2639_v23  ;;  %v686_v33 = vsel %vm685_vm8, %v1789_v51, %v682_v24  ;;  %v2732_v51 = vld [vmem:[#allocation5 + $0x110] sm:$0xff]  ;;  %3270 = vst [vmem:[#allocation19_spill] sm:$0xff] %v2765_v16  ;;  %v2777_v24 = vld [vmem:[#allocation5 + $0x88] sm:$0xff] }
 0x1ab   :  { %v691_v39 = vsel %vm688_vm9, %v690_v37, %v686_v33  ;;  %3271 = vst [vmem:[#allocation18_spill] sm:$0xff] %v2768_v18  ;;  %v2787_v33 = vld [vmem:[#allocation5 + $0x68] sm:$0xff]  ;;  %v2791_v37 = vld [vmem:[#allocation5 + $0x78] sm:$0xff] }
 0x1ac   :  { %3272 = vst [vmem:[#allocation20_spill] sm:$0xff] %v2771_v20 }
 0x1ad   :  { %3273 = vst [vmem:[#allocation17_spill] sm:$0xff] %v2774_v21 }
 0x1ae   :  { %3274 = vst [vmem:[#allocation25_spill] sm:$0xff] %v2777_v24 }
 0x1af   :  { %3277 = vst [vmem:[#allocation22_spill] sm:$0xff] %v2787_v33 }
 0x1b0   :  { %v1793_v38 = vpop.eup %1792  ;;  %3278 = vst [vmem:[#allocation29_spill] sm:$0xff] %v2791_v37 }
 0x1b1   :  { %v694_v40 = vmul.f32 %v1793_v38, %v691_v39  ;;  %v2794_v38 = vld [vmem:[#allocation5 + $0x40] sm:$0xff] }
 0x1b2   :  { %3279 = vst [vmem:[#allocation27_spill] sm:$0xff] %v2794_v38  ;;  %v2802_v39 = vld [vmem:[#allocation5 + $0x20] sm:$0xff] }
 0x1b3   :  { %718 = vmatmul.f32.vlgmr.msrb.gmra.mxu0 %v694_v40  ;;  %738 = vmatmul.f32.vlgmr.msra.gmra.mxu1 %v694_v40  ;;  %3281 = vst [vmem:[#allocation26_spill] sm:$0xff] %v2802_v39 }
 0x1b4   :  { %758 = vmatmul.f32.vlgmr.msra.gmra.mxu2 %v694_v40  ;;  %778 = vmatmul.f32.vlgmr.msra.gmra.mxu3 %v694_v40  ;;  %v3283_v40 = vld [vmem:[#allocation43_spill] sm:$0xff] }
 0x1b5   :  { %1010 = vmatpush.msrb.mxu0 %v2642_v54  ;;  %1030 = vmatpush.msra.mxu1 %v2645_v41 }
 0x1b6   :  { %1050 = vmatpush.msra.mxu2 %v2648_v42  ;;  %1070 = vmatpush.msra.mxu3 %v2651_v43 }
 0x1b7   :  { %1011 = vmatpush.msrb.mxu0 %v2654_v44  ;;  %1031 = vmatpush.msra.mxu1 %v2657_v46 }
 0x1b8   :  { %1051 = vmatpush.msra.mxu2 %v2660_v47  ;;  %1071 = vmatpush.msra.mxu3 %v2663_v48 }
 0x1b9   :  { %1012 = vmatpush.msrb.mxu0 %v2666_v49  ;;  %1032 = vmatpush.msra.mxu1 %v2669_v50 }
 0x1ba   :  { %1052 = vmatpush.msra.mxu2 %v2672_v52  ;;  %1072 = vmatpush.msra.mxu3 %v2675_v53 }
 0x1bb   :  { %1013 = vmatpush.msrb.mxu0 %v2678_v9  ;;  %1033 = vmatpush.msra.mxu1 %v2681_v56 }
 0x1bc   :  { %1053 = vmatpush.msra.mxu2 %v2684_v2  ;;  %1073 = vmatpush.msra.mxu3 %v2687_v7 }
 0x1bd   :  { %1014 = vmatpush.msrb.mxu0 %v2690_v59  ;;  %1034 = vmatpush.msra.mxu1 %v2693_v1 }
 0x1be   :  { %1054 = vmatpush.msra.mxu2 %v2696_v63  ;;  %1074 = vmatpush.msra.mxu3 %v2699_v45 }
 0x1bf   :  { %1015 = vmatpush.msrb.mxu0 %v2702_v19  ;;  %1035 = vmatpush.msra.mxu1 %v2705_v4 }
 0x1c0   :  { %1055 = vmatpush.msra.mxu2 %v2708_v55  ;;  %1075 = vmatpush.msra.mxu3 %v2711_v60 }
 0x1c1   :  { %1016 = vmatpush.msrb.mxu0 %v2714_v61  ;;  %1036 = vmatpush.msra.mxu1 %v2717_v3 }
 0x1c2   :  { %1056 = vmatpush.msra.mxu2 %v2720_v6  ;;  %1076 = vmatpush.msra.mxu3 %v2723_v62 }
 0x1c3   :  { %1017 = vmatpush.msrb.mxu0 %v2726_v8  ;;  %1037 = vmatpush.msra.mxu1 %v2729_v5 }
 0x1c4   :  { %1057 = vmatpush.msra.mxu2 %v2732_v51  ;;  %1077 = vmatpush.msra.mxu3 %v2735_v0 }
 0x1c5   :  { %1018 = vmatpush.msrb.mxu0 %v2738_v58  ;;  %1038 = vmatpush.msra.mxu1 %v2741_v32 }
 0x1c6   :  { %1058 = vmatpush.msra.mxu2 %v2744_v57  ;;  %1078 = vmatpush.msra.mxu3 %v2747_v10 }
 0x1c7   :  { %1019 = vmatpush.msrb.mxu0 %v2750_v11  ;;  %1039 = vmatpush.msra.mxu1 %v2753_v12 }
 0x1c8   :  { %1059 = vmatpush.msra.mxu2 %v2756_v13  ;;  %1079 = vmatpush.msra.mxu3 %v2759_v14 }
 0x1c9   :  { %1020 = vmatpush.msrb.mxu0 %v2762_v15  ;;  %1040 = vmatpush.msra.mxu1 %v2765_v16 }
 0x1ca   :  { %1060 = vmatpush.msra.mxu2 %v2768_v18  ;;  %1080 = vmatpush.msra.mxu3 %v2771_v20 }
 0x1cb   :  { %1021 = vmatpush.msrb.mxu0 %v2774_v21  ;;  %1041 = vmatpush.msra.mxu1 %v2777_v24 }
 0x1cc   :  { %1061 = vmatpush.msra.mxu2 %v3245_v17  ;;  %1081 = vmatpush.msra.mxu3 %v2781_v25  ;;  %v2797_v17 = vld [vmem:[#allocation5 + $0x48] sm:$0xff] }
 0x1cd   :  { %1022 = vmatpush.msrb.mxu0 %v2784_v28  ;;  %1042 = vmatpush.msra.mxu1 %v2787_v33  ;;  %3280 = vst [vmem:[#allocation24_spill] sm:$0xff] %v2797_v17 }
 0x1ce   :  { %1062 = vmatpush.msra.mxu2 %v3249_v22  ;;  %1082 = vmatpush.msra.mxu3 %v2791_v37  ;;  %v2808_v22 = vld [vmem:[#allocation5] sm:$0xff]  ;;  %v3285_v37 = vld [vmem:[#allocation50_spill] sm:$0xff] }
 0x1cf   :  { %1023 = vmatpush.msrb.mxu0 %v2794_v38  ;;  %1043 = vmatpush.msra.mxu1 %v2797_v17  ;;  %3282 = vst [vmem:[#allocation33_spill] sm:$0xff] %v2808_v22  ;;  %v3284_v17 = vld [vmem:[#allocation48_spill] sm:$0xff] }
 0x1d0   :  { %1063 = vmatpush.msra.mxu2 %v3253_v26  ;;  %1083 = vmatpush.msra.mxu3 %v3254_v27 }
 0x1d1   :  { %1024 = vmatpush.msrb.mxu0 %v2802_v39  ;;  %1044 = vmatpush.msra.mxu1 %v3256_v29 }
 0x1d2   :  { %1064 = vmatpush.msra.mxu2 %v3257_v30  ;;  %1084 = vmatpush.msra.mxu3 %v3258_v31 }
 0x1d3   :  { %1025 = vmatpush.msrb.mxu0 %v2808_v22  ;;  %1045 = vmatpush.msra.mxu1 %v3260_v34 }
 0x1d4   :  { %1065 = vmatpush.msra.mxu2 %v3261_v35  ;;  %1085 = vmatpush.msra.mxu3 %v3262_v36 }
 0x230   :  { %v719_v26 = vpop.f32.mrf.mxu0  ;;  %v739_v27 = vpop.f32.mrf.mxu1 }
 0x231   :  { %v782_v39 = vadd.f32 %v719_v26, %v3283_v40  ;;  %v783_v29 = vadd.f32 %v739_v27, %v3284_v17  ;;  %v3286_v17 = vld [vmem:[#allocation49_spill] sm:$0xff] }
 0x233   :  { %v1732_v38 = vmul.f32 -1.442695, %v782_v39  ;;  %v1733_v30 = vmul.f32 -1.442695, %v783_v29 }
 0x235   :  { %1794 = vpow2.f32 %v1732_v38 }
 0x236   :  { %1796 = vpow2.f32 %v1733_v30 }
 0x237   :  { %v779_v31 = vpop.f32.mrf.mxu3  ;;  %v759_v36 = vpop.f32.mrf.mxu2 }
 0x238   :  { %v785_v33 = vadd.f32 %v779_v31, %v3285_v37  ;;  %v784_v39 = vadd.f32 %v759_v36, %v3286_v17 }
 0x23a   :  { %v1734_v22 = vmul.f32 -1.442695, %v785_v33 }
 0x23b   :  { %v1795_v28 = vpop.eup %1794 }
 0x23c   :  { %v1797_v34 = vpop.eup %1796  ;;  %v792_v25 = vadd.f32 1.0, %v1795_v28  ;;  %1798 = vpow2.f32 %v1734_v22 }
 0x23d   :  { %v793_v35 = vadd.f32 1.0, %v1797_v34 }
 0x23e   :  { %1800 = vrcp.f32 %v792_v25  ;;  %v805_v33 = vand.u32 2147483648, %v792_v25  ;;  %v803_v22 = vand.u32 2147483647, %v792_v25  ;;  %vm799_vm12 = vweird.f32 %v792_v25 }
 0x23f   :  { %1802 = vrcp.f32 %v793_v35  ;;  %v820_v31 = vand.u32 2147483648, %v793_v35  ;;  %v818_v21 = vand.u32 2147483647, %v793_v35  ;;  %vm814_vm13 = vweird.f32 %v793_v35 }
 0x240   :  { %v806_v36 = vor.u32 1.1754944e-38, %v805_v33  ;;  %vm804_vm0 = vcmp.eq.f32.partialorder %v803_v22, 8.507059e+37 }
 0x241   :  { %vm819_vm1 = vcmp.eq.f32.partialorder %v818_v21, 8.507059e+37 }
 0x242   :  { %v1799_v24 = vpop.eup %1798 }
 0x243   :  { %v831_v26 = vadd.f32 1.0, %v1799_v24 }
 0x244   :  { %v1801_v40 = vpop.eup %1800 }
 0x245   :  { %v1803_v27 = vpop.eup %1802  ;;  %v795_v38 = vmul.f32 %v1801_v40, %v792_v25  ;;  %1804 = vrcp.f32 %v831_v26  ;;  %vm800_vm10 = vweird.f32 %v1801_v40  ;;  %v843_v33 = vand.u32 2147483648, %v831_v26 }
 0x246   :  { %v810_v29 = vmul.f32 %v1803_v27, %v793_v35  ;;  %1806 = vtanh.f32 %v784_v39  ;;  %vm815_vm11 = vweird.f32 %v1803_v27  ;;  %vm801_vm14 = vmor %vm799_vm12, %vm800_vm10  ;;  %vm837_vm3 = vweird.f32 %v831_v26 }
 0x247   :  { %v796_v30 = vsub.f32 1.0, %v795_v38  ;;  %vm816_vm15 = vmor %vm814_vm13, %vm815_vm11  ;;  %v821_v38 = vor.u32 1.1754944e-38, %v820_v31  ;;  %v844_v22 = vor.u32 1.1754944e-38, %v843_v33  ;;  %v3305_v33 = vld [vmem:[#allocation26_spill] sm:$0xff] }
 0x248   :  { %v811_v37 = vsub.f32 1.0, %v810_v29 }
 0x249   :  { %v797_v28 = vmul.f32 %v1801_v40, %v796_v30 }
 0x24a   :  { %v812_v34 = vmul.f32 %v1803_v27, %v811_v37 }
 0x24b   :  { %v1805_v20 = vpop.eup %1804  ;;  %v798_v24 = vadd.f32 %v1801_v40, %v797_v28 }
 0x24c   :  { %v813_v17 = vadd.f32 %v1803_v27, %v812_v34  ;;  %v833_v18 = vmul.f32 %v1805_v20, %v831_v26  ;;  %v1807_v39 = vpop.eup %1806  ;;  %vm838_vm2 = vweird.f32 %v1805_v20  ;;  %v3294_v34 = vld [vmem:[#allocation25_spill] sm:$0xff] }
 0x24d   :  { %v802_v29 = vsel %vm801_vm14, %v1801_v40, %v798_v24  ;;  %v841_v40 = vand.u32 2147483647, %v831_v26  ;;  %vm839_vm4 = vmor %vm837_vm3, %vm838_vm2  ;;  %v3293_v26 = vld [vmem:[#allocation17_spill] sm:$0xff]  ;;  %v2868_v24 = vld [vmem:[#allocation5 + $0x90] sm:$0xff] }
 0x24e   :  { %v807_v16 = vsel %vm804_vm0, %v806_v36, %v802_v29  ;;  %v817_v30 = vsel %vm816_vm15, %v1803_v27, %v813_v17  ;;  %v834_v15 = vsub.f32 1.0, %v833_v18  ;;  %3295 = vst [vmem:[#allocation31_spill] sm:$0xff] %v2868_v24  ;;  %v3296_v36 = vld [vmem:[#allocation23_spill] sm:$0xff]  ;;  %v3297_v17 = vld [vmem:[#allocation21_spill] sm:$0xff] }
 0x24f   :  { %v822_v37 = vsel %vm819_vm1, %v821_v38, %v817_v30  ;;  %v826_v14 = vmul.f32 %v1807_v39, %v807_v16  ;;  %vm842_vm5 = vcmp.eq.f32.partialorder %v841_v40, 8.507059e+37  ;;  %v3291_v16 = vld [vmem:[#allocation18_spill] sm:$0xff]  ;;  %v2874_v29 = vld [vmem:[#allocation5 + $0x70] sm:$0xff]  ;;  %v3300_v39 = vld [vmem:[#allocation29_spill] sm:$0xff] }
 0x250   :  { %v825_v13 = vmul.f32 %v822_v37, %v2639_v23  ;;  %v835_v28 = vmul.f32 %v1805_v20, %v834_v15  ;;  %v3287_v23 = vld [vmem:[#allocation15_spill] sm:$0xff]  ;;  %v3298_v38 = vld [vmem:[#allocation22_spill] sm:$0xff]  ;;  %3299 = vst [vmem:[#allocation28_spill] sm:$0xff] %v2874_v29  ;;  %v3302_v37 = vld [vmem:[#allocation24_spill] sm:$0xff] }
 0x251   :  { %v3290_v15 = vld [vmem:[#allocation19_spill] sm:$0xff]  ;;  %v2887_v40 = vld [vmem:[#allocation5 + $0x28] sm:$0xff] }
 0x252   :  { %v2819_v25 = vadd.f32 %v826_v14, %v825_v13  ;;  %v836_v35 = vadd.f32 %v1805_v20, %v835_v28  ;;  %v3288_v13 = vld [vmem:[#allocation16_spill] sm:$0xff]  ;;  %v3289_v14 = vld [vmem:[#allocation14_spill] sm:$0xff]  ;;  %v3301_v30 = vld [vmem:[#allocation27_spill] sm:$0xff]  ;;  %3306 = vst [vmem:[#allocation35_spill] sm:$0xff] %v2887_v40 }
 0x253   :  { %v2880_v28 = vld [vmem:[#allocation5 + $0x50] sm:$0xff] }
 0x254   :  { %1808 = vtanh.f32 %v2819_v25  ;;  %v840_v31 = vsel %vm839_vm4, %v1805_v20, %v836_v35  ;;  %v3292_v20 = vld [vmem:[#allocation20_spill] sm:$0xff]  ;;  %3303 = vst [vmem:[#allocation30_spill] sm:$0xff] %v2880_v28 }
 0x255   :  { %v845_v18 = vsel %vm842_vm5, %v844_v22, %v840_v31  ;;  %v2883_v35 = vld [vmem:[#allocation5 + $0x58] sm:$0xff]  ;;  %v2890_v31 = vld [vmem:[#allocation5 + $0x30] sm:$0xff] }
 0x256   :  { %3304 = vst [vmem:[#allocation36_spill] sm:$0xff] %v2883_v35  ;;  %v2893_v22 = vld [vmem:[#allocation5 + $0x38] sm:$0xff] }
 0x257   :  { %3307 = vst [vmem:[#allocation32_spill] sm:$0xff] %v2890_v31 }
 0x258   :  { %3308 = vst [vmem:[#allocation34_spill] sm:$0xff] %v2893_v22 }
 0x25a   :  { %v1809_v21 = vpop.eup %1808 }
 0x25b   :  { %v848_v27 = vmul.f32 %v1809_v21, %v845_v18  ;;  %v3309_v21 = vld [vmem:[#allocation33_spill] sm:$0xff]  ;;  %v2897_v18 = vld [vmem:[#allocation5 + $0x8] sm:$0xff] }
 0x25c   :  { %3310 = vst [vmem:[#allocation38_spill] sm:$0xff] %v2897_v18 }
 0x25d   :  { %872 = vmatmul.f32.vlgmr.msra.gmra.mxu0 %v848_v27  ;;  %892 = vmatmul.f32.vlgmr.msrb.gmra.mxu1 %v848_v27 }
 0x25e   :  { %912 = vmatmul.f32.vlgmr.msrb.gmra.mxu2 %v848_v27  ;;  %932 = vmatmul.f32.vlgmr.msrb.gmra.mxu3 %v848_v27  ;;  %v2900_v27 = vld [vmem:[#allocation5 + $0x10] sm:$0xff] }
 0x25f   :  { %1164 = vmatpush.msra.mxu0 %v2642_v54  ;;  %1184 = vmatpush.msrb.mxu1 %v2645_v41  ;;  %3311 = vst [vmem:[#allocation37_spill] sm:$0xff] %v2900_v27 }
 0x260   :  { %1204 = vmatpush.msrb.mxu2 %v2648_v42  ;;  %1224 = vmatpush.msrb.mxu3 %v2651_v43 }
 0x261   :  { %1165 = vmatpush.msra.mxu0 %v2654_v44  ;;  %1185 = vmatpush.msrb.mxu1 %v2657_v46 }
 0x262   :  { %1205 = vmatpush.msrb.mxu2 %v2660_v47  ;;  %1225 = vmatpush.msrb.mxu3 %v2663_v48 }
 0x263   :  { %1166 = vmatpush.msra.mxu0 %v2666_v49  ;;  %1186 = vmatpush.msrb.mxu1 %v2669_v50 }
 0x264   :  { %1206 = vmatpush.msrb.mxu2 %v2672_v52  ;;  %1226 = vmatpush.msrb.mxu3 %v2675_v53 }
 0x265   :  { %1167 = vmatpush.msra.mxu0 %v2678_v9  ;;  %1187 = vmatpush.msrb.mxu1 %v2681_v56 }
 0x266   :  { %1207 = vmatpush.msrb.mxu2 %v2684_v2  ;;  %1227 = vmatpush.msrb.mxu3 %v2687_v7 }
 0x267   :  { %1168 = vmatpush.msra.mxu0 %v2690_v59  ;;  %1188 = vmatpush.msrb.mxu1 %v2693_v1 }
 0x268   :  { %1208 = vmatpush.msrb.mxu2 %v2696_v63  ;;  %1228 = vmatpush.msrb.mxu3 %v2699_v45 }
 0x269   :  { %1169 = vmatpush.msra.mxu0 %v2702_v19  ;;  %1189 = vmatpush.msrb.mxu1 %v2705_v4 }
 0x26a   :  { %1209 = vmatpush.msrb.mxu2 %v2708_v55  ;;  %1229 = vmatpush.msrb.mxu3 %v2711_v60 }
 0x26b   :  { %1170 = vmatpush.msra.mxu0 %v2714_v61  ;;  %1190 = vmatpush.msrb.mxu1 %v2717_v3 }
 0x26c   :  { %1210 = vmatpush.msrb.mxu2 %v2720_v6  ;;  %1230 = vmatpush.msrb.mxu3 %v2723_v62 }
 0x26d   :  { %1171 = vmatpush.msra.mxu0 %v2726_v8  ;;  %1191 = vmatpush.msrb.mxu1 %v2729_v5 }
 0x26e   :  { %1211 = vmatpush.msrb.mxu2 %v2732_v51  ;;  %1231 = vmatpush.msrb.mxu3 %v2735_v0 }
 0x26f   :  { %1172 = vmatpush.msra.mxu0 %v2738_v58  ;;  %1192 = vmatpush.msrb.mxu1 %v2741_v32 }
 0x270   :  { %1212 = vmatpush.msrb.mxu2 %v2744_v57  ;;  %1232 = vmatpush.msrb.mxu3 %v2747_v10 }
 0x271   :  { %1173 = vmatpush.msra.mxu0 %v2750_v11  ;;  %1193 = vmatpush.msrb.mxu1 %v2753_v12 }
 0x272   :  { %1213 = vmatpush.msrb.mxu2 %v3287_v23  ;;  %1233 = vmatpush.msrb.mxu3 %v3288_v13 }
 0x273   :  { %1174 = vmatpush.msra.mxu0 %v3289_v14  ;;  %1194 = vmatpush.msrb.mxu1 %v3290_v15 }
 0x274   :  { %1214 = vmatpush.msrb.mxu2 %v3291_v16  ;;  %1234 = vmatpush.msrb.mxu3 %v3292_v20 }
 0x275   :  { %1175 = vmatpush.msra.mxu0 %v3293_v26  ;;  %1195 = vmatpush.msrb.mxu1 %v3294_v34 }
 0x276   :  { %1215 = vmatpush.msrb.mxu2 %v2868_v24  ;;  %1235 = vmatpush.msrb.mxu3 %v3296_v36 }
 0x277   :  { %1176 = vmatpush.msra.mxu0 %v3297_v17  ;;  %1196 = vmatpush.msrb.mxu1 %v3298_v38 }
 0x278   :  { %1216 = vmatpush.msrb.mxu2 %v2874_v29  ;;  %1236 = vmatpush.msrb.mxu3 %v3300_v39 }
 0x279   :  { %1177 = vmatpush.msra.mxu0 %v3301_v30  ;;  %1197 = vmatpush.msrb.mxu1 %v3302_v37  ;;  %v3314_v37 = vld [vmem:[#allocation51_spill] sm:$0xff] }
 0x27a   :  { %1217 = vmatpush.msrb.mxu2 %v2880_v28  ;;  %1237 = vmatpush.msrb.mxu3 %v2883_v35  ;;  %v3313_v35 = vld [vmem:[#allocation47_spill] sm:$0xff] }
 0x27b   :  { %1178 = vmatpush.msra.mxu0 %v3305_v33  ;;  %1198 = vmatpush.msrb.mxu1 %v2887_v40  ;;  %v2903_v33 = vld [vmem:[#allocation5 + $0x18] sm:$0xff] }
 0x27c   :  { %1218 = vmatpush.msrb.mxu2 %v2890_v31  ;;  %1238 = vmatpush.msrb.mxu3 %v2893_v22  ;;  %3312 = vst [vmem:[#allocation42_spill] sm:$0xff] %v2903_v33 }
 0x27d   :  { %1179 = vmatpush.msra.mxu0 %v3309_v21  ;;  %1199 = vmatpush.msrb.mxu1 %v2897_v18  ;;  %v3315_v18 = vld [vmem:[#allocation54_spill] sm:$0xff] }
 0x27e   :  { %1219 = vmatpush.msrb.mxu2 %v2900_v27  ;;  %1239 = vmatpush.msrb.mxu3 %v2903_v33 }
 0x2da   :  { %v873_v40 = vpop.f32.mrf.mxu0  ;;  %v893_v31 = vpop.f32.mrf.mxu1 }
 0x2db   :  { %v936_v28 = vadd.f32 %v873_v40, %v3313_v35  ;;  %v937_v22 = vadd.f32 %v893_v31, %v3314_v37  ;;  %v3316_v37 = vld [vmem:[#allocation53_spill] sm:$0xff] }
 0x2dd   :  { %v1735_v30 = vmul.f32 -1.442695, %v936_v28  ;;  %v1736_v21 = vmul.f32 -1.442695, %v937_v22 }
 0x2df   :  { %1810 = vpow2.f32 %v1735_v30 }
 0x2e0   :  { %1812 = vpow2.f32 %v1736_v21 }
 0x2e1   :  { %v933_v39 = vpop.f32.mrf.mxu3  ;;  %v913_v33 = vpop.f32.mrf.mxu2 }
 0x2e2   :  { %v939_v29 = vadd.f32 %v933_v39, %v3315_v18  ;;  %v938_v28 = vadd.f32 %v913_v33, %v3316_v37 }
 0x2e4   :  { %v1737_v38 = vmul.f32 -1.442695, %v939_v29 }
 0x2e5   :  { %v1811_v17 = vpop.eup %1810 }
 0x2e6   :  { %v1813_v27 = vpop.eup %1812  ;;  %v946_v36 = vadd.f32 1.0, %v1811_v17  ;;  %1814 = vpow2.f32 %v1737_v38 }
 0x2e7   :  { %v947_v24 = vadd.f32 1.0, %v1813_v27 }
 0x2e8   :  { %1816 = vrcp.f32 %v946_v36  ;;  %v959_v29 = vand.u32 2147483648, %v946_v36  ;;  %v957_v38 = vand.u32 2147483647, %v946_v36  ;;  %vm953_vm8 = vweird.f32 %v946_v36 }
 0x2e9   :  { %1818 = vrcp.f32 %v947_v24  ;;  %v974_v18 = vand.u32 2147483648, %v947_v24  ;;  %v972_v26 = vand.u32 2147483647, %v947_v24  ;;  %vm968_vm9 = vweird.f32 %v947_v24 }
 0x2ea   :  { %v960_v33 = vor.u32 1.1754944e-38, %v959_v29  ;;  %vm958_vm12 = vcmp.eq.f32.partialorder %v957_v38, 8.507059e+37 }
 0x2eb   :  { %vm973_vm13 = vcmp.eq.f32.partialorder %v972_v26, 8.507059e+37 }
 0x2ec   :  { %v1815_v34 = vpop.eup %1814 }
 0x2ed   :  { %v985_v35 = vadd.f32 1.0, %v1815_v34 }
 0x2ee   :  { %v1817_v40 = vpop.eup %1816 }
 0x2ef   :  { %v1819_v31 = vpop.eup %1818  ;;  %v949_v30 = vmul.f32 %v1817_v40, %v946_v36  ;;  %1820 = vrcp.f32 %v985_v35  ;;  %vm954_vm6 = vweird.f32 %v1817_v40  ;;  %v997_v29 = vand.u32 2147483648, %v985_v35 }
 0x2f0   :  { %v964_v22 = vmul.f32 %v1819_v31, %v947_v24  ;;  %1822 = vtanh.f32 %v938_v28  ;;  %vm969_vm7 = vweird.f32 %v1819_v31  ;;  %vm955_vm10 = vmor %vm953_vm8, %vm954_vm6  ;;  %vm991_vm15 = vweird.f32 %v985_v35 }
 0x2f1   :  { %v950_v21 = vsub.f32 1.0, %v949_v30  ;;  %vm970_vm11 = vmor %vm968_vm9, %vm969_vm7  ;;  %v975_v30 = vor.u32 1.1754944e-38, %v974_v18  ;;  %v998_v38 = vor.u32 1.1754944e-38, %v997_v29  ;;  %v3335_v29 = vld [vmem:[#allocation26_spill] sm:$0xff] }
 0x2f2   :  { %v965_v39 = vsub.f32 1.0, %v964_v22 }
 0x2f3   :  { %v951_v17 = vmul.f32 %v1817_v40, %v950_v21 }
 0x2f4   :  { %v966_v27 = vmul.f32 %v1819_v31, %v965_v39 }
 0x2f5   :  { %v1821_v20 = vpop.eup %1820  ;;  %v952_v34 = vadd.f32 %v1817_v40, %v951_v17 }
 0x2f6   :  { %v967_v37 = vadd.f32 %v1819_v31, %v966_v27  ;;  %v987_v16 = vmul.f32 %v1821_v20, %v985_v35  ;;  %v1823_v28 = vpop.eup %1822  ;;  %vm992_vm14 = vweird.f32 %v1821_v20  ;;  %v3324_v27 = vld [vmem:[#allocation25_spill] sm:$0xff] }
 0x2f7   :  { %v956_v22 = vsel %vm955_vm10, %v1817_v40, %v952_v34  ;;  %v995_v40 = vand.u32 2147483647, %v985_v35  ;;  %vm993_vm0 = vmor %vm991_vm15, %vm992_vm14  ;;  %v3323_v35 = vld [vmem:[#allocation17_spill] sm:$0xff]  ;;  %v3325_v34 = vld [vmem:[#allocation31_spill] sm:$0xff] }
 0x2f8   :  { %v961_v15 = vsel %vm958_vm12, %v960_v33, %v956_v22  ;;  %v971_v21 = vsel %vm970_vm11, %v1819_v31, %v967_v37  ;;  %v988_v14 = vsub.f32 1.0, %v987_v16  ;;  %v3326_v33 = vld [vmem:[#allocation23_spill] sm:$0xff]  ;;  %v3327_v37 = vld [vmem:[#allocation21_spill] sm:$0xff]  ;;  %v3329_v22 = vld [vmem:[#allocation28_spill] sm:$0xff] }
 0x2f9   :  { %v976_v39 = vsel %vm973_vm13, %v975_v30, %v971_v21  ;;  %v980_v13 = vmul.f32 %v1823_v28, %v961_v15  ;;  %vm996_vm1 = vcmp.eq.f32.partialorder %v995_v40, 8.507059e+37  ;;  %v3321_v15 = vld [vmem:[#allocation18_spill] sm:$0xff]  ;;  %v3330_v28 = vld [vmem:[#allocation29_spill] sm:$0xff]  ;;  %v3331_v21 = vld [vmem:[#allocation27_spill] sm:$0xff] }
 0x2fa   :  { %v979_v23 = vmul.f32 %v976_v39, %v2819_v25  ;;  %v989_v17 = vmul.f32 %v1821_v20, %v988_v14  ;;  %v3317_v25 = vld [vmem:[#allocation15_spill] sm:$0xff]  ;;  %v3328_v30 = vld [vmem:[#allocation22_spill] sm:$0xff]  ;;  %v3332_v39 = vld [vmem:[#allocation24_spill] sm:$0xff] }
 0x2fb   :  { %v3320_v14 = vld [vmem:[#allocation19_spill] sm:$0xff] }
 0x2fc   :  { %v2911_v36 = vadd.f32 %v980_v13, %v979_v23  ;;  %v990_v24 = vadd.f32 %v1821_v20, %v989_v17  ;;  %v3318_v23 = vld [vmem:[#allocation16_spill] sm:$0xff]  ;;  %v3319_v13 = vld [vmem:[#allocation14_spill] sm:$0xff]  ;;  %v3336_v40 = vld [vmem:[#allocation35_spill] sm:$0xff] }
 0x2fd   :  { %v3333_v17 = vld [vmem:[#allocation30_spill] sm:$0xff] }
 0x2fe   :  { %1824 = vtanh.f32 %v2911_v36  ;;  %v994_v18 = vsel %vm993_vm0, %v1821_v20, %v990_v24  ;;  %v3322_v20 = vld [vmem:[#allocation20_spill] sm:$0xff] }
 0x2ff   :  { %v999_v16 = vsel %vm996_vm1, %v998_v38, %v994_v18  ;;  %v3334_v24 = vld [vmem:[#allocation36_spill] sm:$0xff]  ;;  %v3338_v38 = vld [vmem:[#allocation34_spill] sm:$0xff] }
 0x300   :  { %v3337_v18 = vld [vmem:[#allocation32_spill] sm:$0xff] }
 0x304   :  { %v1825_v26 = vpop.eup %1824 }
 0x305   :  { %v1002_v31 = vmul.f32 %v1825_v26, %v999_v16  ;;  %v3339_v26 = vld [vmem:[#allocation33_spill] sm:$0xff]  ;;  %v3340_v16 = vld [vmem:[#allocation38_spill] sm:$0xff] }
 0x307   :  { %1026 = vmatmul.f32.vlgmr.msrb.gmra.mxu0 %v1002_v31  ;;  %1046 = vmatmul.f32.vlgmr.msra.gmra.mxu1 %v1002_v31 }
 0x308   :  { %1066 = vmatmul.f32.vlgmr.msra.gmra.mxu2 %v1002_v31  ;;  %1086 = vmatmul.f32.vlgmr.msra.gmra.mxu3 %v1002_v31  ;;  %v3341_v31 = vld [vmem:[#allocation37_spill] sm:$0xff] }
 0x309   :  { %1318 = vmatpush.msrb.mxu0 %v2642_v54  ;;  %1338 = vmatpush.msra.mxu1 %v2645_v41 }
 0x30a   :  { %1358 = vmatpush.msra.mxu2 %v2648_v42  ;;  %1378 = vmatpush.msra.mxu3 %v2651_v43 }
 0x30b   :  { %1319 = vmatpush.msrb.mxu0 %v2654_v44  ;;  %1339 = vmatpush.msra.mxu1 %v2657_v46 }
 0x30c   :  { %1359 = vmatpush.msra.mxu2 %v2660_v47  ;;  %1379 = vmatpush.msra.mxu3 %v2663_v48 }
 0x30d   :  { %1320 = vmatpush.msrb.mxu0 %v2666_v49  ;;  %1340 = vmatpush.msra.mxu1 %v2669_v50 }
 0x30e   :  { %1360 = vmatpush.msra.mxu2 %v2672_v52  ;;  %1380 = vmatpush.msra.mxu3 %v2675_v53 }
 0x30f   :  { %1321 = vmatpush.msrb.mxu0 %v2678_v9  ;;  %1341 = vmatpush.msra.mxu1 %v2681_v56 }
 0x310   :  { %1361 = vmatpush.msra.mxu2 %v2684_v2  ;;  %1381 = vmatpush.msra.mxu3 %v2687_v7 }
 0x311   :  { %1322 = vmatpush.msrb.mxu0 %v2690_v59  ;;  %1342 = vmatpush.msra.mxu1 %v2693_v1 }
 0x312   :  { %1362 = vmatpush.msra.mxu2 %v2696_v63  ;;  %1382 = vmatpush.msra.mxu3 %v2699_v45 }
 0x313   :  { %1323 = vmatpush.msrb.mxu0 %v2702_v19  ;;  %1343 = vmatpush.msra.mxu1 %v2705_v4 }
 0x314   :  { %1363 = vmatpush.msra.mxu2 %v2708_v55  ;;  %1383 = vmatpush.msra.mxu3 %v2711_v60 }
 0x315   :  { %1324 = vmatpush.msrb.mxu0 %v2714_v61  ;;  %1344 = vmatpush.msra.mxu1 %v2717_v3 }
 0x316   :  { %1364 = vmatpush.msra.mxu2 %v2720_v6  ;;  %1384 = vmatpush.msra.mxu3 %v2723_v62 }
 0x317   :  { %1325 = vmatpush.msrb.mxu0 %v2726_v8  ;;  %1345 = vmatpush.msra.mxu1 %v2729_v5 }
 0x318   :  { %1365 = vmatpush.msra.mxu2 %v2732_v51  ;;  %1385 = vmatpush.msra.mxu3 %v2735_v0 }
 0x319   :  { %1326 = vmatpush.msrb.mxu0 %v2738_v58  ;;  %1346 = vmatpush.msra.mxu1 %v2741_v32 }
 0x31a   :  { %1366 = vmatpush.msra.mxu2 %v2744_v57  ;;  %1386 = vmatpush.msra.mxu3 %v2747_v10 }
 0x31b   :  { %1327 = vmatpush.msrb.mxu0 %v2750_v11  ;;  %1347 = vmatpush.msra.mxu1 %v2753_v12 }
 0x31c   :  { %1367 = vmatpush.msra.mxu2 %v3317_v25  ;;  %1387 = vmatpush.msra.mxu3 %v3318_v23 }
 0x31d   :  { %1328 = vmatpush.msrb.mxu0 %v3319_v13  ;;  %1348 = vmatpush.msra.mxu1 %v3320_v14 }
 0x31e   :  { %1368 = vmatpush.msra.mxu2 %v3321_v15  ;;  %1388 = vmatpush.msra.mxu3 %v3322_v20 }
 0x31f   :  { %1329 = vmatpush.msrb.mxu0 %v3323_v35  ;;  %1349 = vmatpush.msra.mxu1 %v3324_v27 }
 0x320   :  { %1369 = vmatpush.msra.mxu2 %v3325_v34  ;;  %1389 = vmatpush.msra.mxu3 %v3326_v33 }
 0x321   :  { %1330 = vmatpush.msrb.mxu0 %v3327_v37  ;;  %1350 = vmatpush.msra.mxu1 %v3328_v30 }
 0x322   :  { %1370 = vmatpush.msra.mxu2 %v3329_v22  ;;  %1390 = vmatpush.msra.mxu3 %v3330_v28  ;;  %v3343_v28 = vld [vmem:[#allocation52_spill] sm:$0xff]  ;;  %v3344_v22 = vld [vmem:[#allocation55_spill] sm:$0xff] }
 0x323   :  { %1331 = vmatpush.msrb.mxu0 %v3331_v21  ;;  %1351 = vmatpush.msra.mxu1 %v3332_v39  ;;  %v3342_v21 = vld [vmem:[#allocation42_spill] sm:$0xff] }
 0x324   :  { %1371 = vmatpush.msra.mxu2 %v3333_v17  ;;  %1391 = vmatpush.msra.mxu3 %v3334_v24 }
 0x325   :  { %1332 = vmatpush.msrb.mxu0 %v3335_v29  ;;  %1352 = vmatpush.msra.mxu1 %v3336_v40 }
 0x326   :  { %1372 = vmatpush.msra.mxu2 %v3337_v18  ;;  %1392 = vmatpush.msra.mxu3 %v3338_v38  ;;  %v3345_v38 = vld [vmem:[#allocation57_spill] sm:$0xff] }
 0x327   :  { %1333 = vmatpush.msrb.mxu0 %v3339_v26  ;;  %1353 = vmatpush.msra.mxu1 %v3340_v16 }
 0x328   :  { %1373 = vmatpush.msra.mxu2 %v3341_v31  ;;  %1393 = vmatpush.msra.mxu3 %v3342_v21 }
 0x384   :  { %v1027_v39 = vpop.f32.mrf.mxu0  ;;  %v1047_v17 = vpop.f32.mrf.mxu1 }
 0x385   :  { %v1090_v24 = vadd.f32 %v1027_v39, %v3343_v28  ;;  %v1091_v29 = vadd.f32 %v1047_v17, %v3344_v22  ;;  %v3346_v22 = vld [vmem:[#allocation56_spill] sm:$0xff] }
 0x387   :  { %v1738_v30 = vmul.f32 -1.442695, %v1090_v24  ;;  %v1739_v40 = vmul.f32 -1.442695, %v1091_v29 }
 0x389   :  { %1826 = vpow2.f32 %v1738_v30 }
 0x38a   :  { %1828 = vpow2.f32 %v1739_v40 }
 0x38b   :  { %v1087_v18 = vpop.f32.mrf.mxu3  ;;  %v1067_v21 = vpop.f32.mrf.mxu2 }
 0x38c   :  { %v1093_v37 = vadd.f32 %v1087_v18, %v3345_v38  ;;  %v1092_v17 = vadd.f32 %v1067_v21, %v3346_v22 }
 0x38e   :  { %v1740_v26 = vmul.f32 -1.442695, %v1093_v37 }
 0x38f   :  { %v1827_v33 = vpop.eup %1826 }
 0x390   :  { %v1829_v16 = vpop.eup %1828  ;;  %v1100_v34 = vadd.f32 1.0, %v1827_v33  ;;  %1830 = vpow2.f32 %v1740_v26 }
 0x391   :  { %v1101_v31 = vadd.f32 1.0, %v1829_v16 }
 0x392   :  { %1832 = vrcp.f32 %v1100_v34  ;;  %v1113_v37 = vand.u32 2147483648, %v1100_v34  ;;  %v1111_v26 = vand.u32 2147483647, %v1100_v34  ;;  %vm1107_vm4 = vweird.f32 %v1100_v34 }
 0x393   :  { %1834 = vrcp.f32 %v1101_v31  ;;  %v1128_v38 = vand.u32 2147483648, %v1101_v31  ;;  %v1126_v35 = vand.u32 2147483647, %v1101_v31  ;;  %vm1122_vm5 = vweird.f32 %v1101_v31 }
 0x394   :  { %v1114_v21 = vor.u32 1.1754944e-38, %v1113_v37  ;;  %vm1112_vm8 = vcmp.eq.f32.partialorder %v1111_v26, 8.507059e+37 }
 0x395   :  { %vm1127_vm9 = vcmp.eq.f32.partialorder %v1126_v35, 8.507059e+37 }
 0x396   :  { %v1831_v27 = vpop.eup %1830 }
 0x397   :  { %v1139_v28 = vadd.f32 1.0, %v1831_v27 }
 0x398   :  { %v1833_v39 = vpop.eup %1832 }
 0x399   :  { %v1835_v24 = vpop.eup %1834  ;;  %v1103_v30 = vmul.f32 %v1833_v39, %v1100_v34  ;;  %1836 = vrcp.f32 %v1139_v28  ;;  %vm1108_vm2 = vweird.f32 %v1833_v39  ;;  %v1151_v37 = vand.u32 2147483648, %v1139_v28 }
 0x39a   :  { %v1118_v29 = vmul.f32 %v1835_v24, %v1101_v31  ;;  %1838 = vtanh.f32 %v1092_v17  ;;  %vm1123_vm3 = vweird.f32 %v1835_v24  ;;  %vm1109_vm6 = vmor %vm1107_vm4, %vm1108_vm2  ;;  %vm1145_vm11 = vweird.f32 %v1139_v28 }
 0x39b   :  { %v1104_v40 = vsub.f32 1.0, %v1103_v30  ;;  %vm1124_vm7 = vmor %vm1122_vm5, %vm1123_vm3  ;;  %v1129_v30 = vor.u32 1.1754944e-38, %v1128_v38  ;;  %v1152_v26 = vor.u32 1.1754944e-38, %v1151_v37 }
 0x39c   :  { %v1119_v18 = vsub.f32 1.0, %v1118_v29 }
 0x39d   :  { %v1105_v33 = vmul.f32 %v1833_v39, %v1104_v40 }
 0x39e   :  { %v1120_v16 = vmul.f32 %v1835_v24, %v1119_v18 }
 0x39f   :  { %v1837_v20 = vpop.eup %1836  ;;  %v1106_v27 = vadd.f32 %v1833_v39, %v1105_v33 }
 0x3a0   :  { %v1121_v22 = vadd.f32 %v1835_v24, %v1120_v16  ;;  %v1141_v15 = vmul.f32 %v1837_v20, %v1139_v28  ;;  %v1839_v17 = vpop.eup %1838  ;;  %vm1146_vm10 = vweird.f32 %v1837_v20 }
 0x3a1   :  { %v1110_v29 = vsel %vm1109_vm6, %v1833_v39, %v1106_v27  ;;  %v1149_v39 = vand.u32 2147483647, %v1139_v28  ;;  %vm1147_vm12 = vmor %vm1145_vm11, %vm1146_vm10  ;;  %v3376_v27 = vld [vmem:[#allocation59_spill] sm:$0xff] }
 0x3a2   :  { %v1115_v14 = vsel %vm1112_vm8, %v1114_v21, %v1110_v29  ;;  %v1125_v40 = vsel %vm1124_vm7, %v1835_v24, %v1121_v22  ;;  %v1142_v13 = vsub.f32 1.0, %v1141_v15 }
 0x3a3   :  { %v1130_v18 = vsel %vm1127_vm9, %v1129_v30, %v1125_v40  ;;  %v1134_v23 = vmul.f32 %v1839_v17, %v1115_v14  ;;  %vm1150_vm13 = vcmp.eq.f32.partialorder %v1149_v39, 8.507059e+37 }
 0x3a4   :  { %v1133_v25 = vmul.f32 %v1130_v18, %v2911_v36  ;;  %v1143_v33 = vmul.f32 %v1837_v20, %v1142_v13 }
 0x3a6   :  { %v2983_v34 = vadd.f32 %v1134_v23, %v1133_v25  ;;  %v1144_v31 = vadd.f32 %v1837_v20, %v1143_v33 }
 0x3a8   :  { %1840 = vtanh.f32 %v2983_v34  ;;  %v1148_v38 = vsel %vm1147_vm12, %v1837_v20, %v1144_v31 }
 0x3a9   :  { %v1153_v15 = vsel %vm1150_vm13, %v1152_v26, %v1148_v38 }
 0x3ae   :  { %v1841_v35 = vpop.eup %1840 }
 0x3af   :  { %v1156_v24 = vmul.f32 %v1841_v35, %v1153_v15 }
 0x3b1   :  { %1180 = vmatmul.f32.vlgmr.msra.gmra.mxu0 %v1156_v24  ;;  %1200 = vmatmul.f32.vlgmr.msrb.gmra.mxu1 %v1156_v24 }
 0x3b2   :  { %1220 = vmatmul.f32.vlgmr.msrb.gmra.mxu2 %v1156_v24  ;;  %1240 = vmatmul.f32.vlgmr.msrb.gmra.mxu3 %v1156_v24 }
 0x3b3   :  { %1472 = vmatpush.msra.mxu0 %v2642_v54  ;;  %1492 = vmatpush.msrb.mxu1 %v2645_v41  ;;  %v3347_v54 = vld [vmem:[#allocation15_spill] sm:$0xff]  ;;  %v3348_v41 = vld [vmem:[#allocation16_spill] sm:$0xff] }
 0x3b4   :  { %1512 = vmatpush.msrb.mxu2 %v2648_v42  ;;  %1532 = vmatpush.msrb.mxu3 %v2651_v43  ;;  %v3349_v42 = vld [vmem:[#allocation14_spill] sm:$0xff]  ;;  %v3350_v43 = vld [vmem:[#allocation19_spill] sm:$0xff] }
 0x3b5   :  { %1473 = vmatpush.msra.mxu0 %v2654_v44  ;;  %1493 = vmatpush.msrb.mxu1 %v2657_v46  ;;  %v3351_v44 = vld [vmem:[#allocation18_spill] sm:$0xff]  ;;  %v3352_v46 = vld [vmem:[#allocation20_spill] sm:$0xff] }
 0x3b6   :  { %1513 = vmatpush.msrb.mxu2 %v2660_v47  ;;  %1533 = vmatpush.msrb.mxu3 %v2663_v48  ;;  %v3353_v47 = vld [vmem:[#allocation17_spill] sm:$0xff] }
 0x3b7   :  { %1474 = vmatpush.msra.mxu0 %v2666_v49  ;;  %1494 = vmatpush.msrb.mxu1 %v2669_v50  ;;  %v3354_v48 = vld [vmem:[#allocation25_spill] sm:$0xff]  ;;  %v3355_v49 = vld [vmem:[#allocation31_spill] sm:$0xff] }
 0x3b8   :  { %1514 = vmatpush.msrb.mxu2 %v2672_v52  ;;  %1534 = vmatpush.msrb.mxu3 %v2675_v53  ;;  %v3356_v50 = vld [vmem:[#allocation23_spill] sm:$0xff]  ;;  %v3357_v52 = vld [vmem:[#allocation21_spill] sm:$0xff]  ;;  %v3358_v53 = vld [vmem:[#allocation22_spill] sm:$0xff] }
 0x3b9   :  { %1475 = vmatpush.msra.mxu0 %v2678_v9  ;;  %1495 = vmatpush.msrb.mxu1 %v2681_v56  ;;  %v3359_v9 = vld [vmem:[#allocation28_spill] sm:$0xff]  ;;  %v3360_v56 = vld [vmem:[#allocation29_spill] sm:$0xff] }
 0x3ba   :  { %1515 = vmatpush.msrb.mxu2 %v2684_v2  ;;  %1535 = vmatpush.msrb.mxu3 %v2687_v7  ;;  %v3361_v2 = vld [vmem:[#allocation27_spill] sm:$0xff]  ;;  %v3362_v7 = vld [vmem:[#allocation24_spill] sm:$0xff] }
 0x3bb   :  { %1476 = vmatpush.msra.mxu0 %v2690_v59  ;;  %1496 = vmatpush.msrb.mxu1 %v2693_v1  ;;  %v3363_v59 = vld [vmem:[#allocation30_spill] sm:$0xff]  ;;  %v3364_v1 = vld [vmem:[#allocation36_spill] sm:$0xff] }
 0x3bc   :  { %1516 = vmatpush.msrb.mxu2 %v2696_v63  ;;  %1536 = vmatpush.msrb.mxu3 %v2699_v45  ;;  %v3365_v63 = vld [vmem:[#allocation26_spill] sm:$0xff]  ;;  %v3366_v45 = vld [vmem:[#allocation35_spill] sm:$0xff] }
 0x3bd   :  { %1477 = vmatpush.msra.mxu0 %v2702_v19  ;;  %1497 = vmatpush.msrb.mxu1 %v2705_v4  ;;  %v3367_v19 = vld [vmem:[#allocation32_spill] sm:$0xff]  ;;  %v3368_v4 = vld [vmem:[#allocation34_spill] sm:$0xff] }
 0x3be   :  { %1517 = vmatpush.msrb.mxu2 %v2708_v55  ;;  %1537 = vmatpush.msrb.mxu3 %v2711_v60  ;;  %v3369_v55 = vld [vmem:[#allocation33_spill] sm:$0xff]  ;;  %v3370_v60 = vld [vmem:[#allocation38_spill] sm:$0xff] }
 0x3bf   :  { %1478 = vmatpush.msra.mxu0 %v2714_v61  ;;  %1498 = vmatpush.msrb.mxu1 %v2717_v3  ;;  %v3371_v61 = vld [vmem:[#allocation37_spill] sm:$0xff]  ;;  %v3372_v3 = vld [vmem:[#allocation42_spill] sm:$0xff] }
 0x3c0   :  { %1518 = vmatpush.msrb.mxu2 %v2720_v6  ;;  %1538 = vmatpush.msrb.mxu3 %v2723_v62 }
 0x3c1   :  { %1479 = vmatpush.msra.mxu0 %v2726_v8  ;;  %1499 = vmatpush.msrb.mxu1 %v2729_v5  ;;  %v3373_v8 = vld [vmem:[#allocation39_spill] sm:$0xff] }
 0x3c2   :  { %1519 = vmatpush.msrb.mxu2 %v2732_v51  ;;  %1539 = vmatpush.msrb.mxu3 %v2735_v0  ;;  %v3374_v51 = vld [vmem:[#allocation58_spill] sm:$0xff] }
 0x3c3   :  { %1480 = vmatpush.msra.mxu0 %v2738_v58  ;;  %1500 = vmatpush.msrb.mxu1 %v2741_v32 }
 0x3c4   :  { %1520 = vmatpush.msrb.mxu2 %v2744_v57  ;;  %1540 = vmatpush.msrb.mxu3 %v2747_v10  ;;  %v3375_v10 = vld [vmem:[#allocation60_spill] sm:$0xff] }
 0x3c5   :  { %1481 = vmatpush.msra.mxu0 %v2750_v11  ;;  %1501 = vmatpush.msrb.mxu1 %v2753_v12 }
 0x3c6   :  { %1521 = vmatpush.msrb.mxu2 %v3347_v54  ;;  %1541 = vmatpush.msrb.mxu3 %v3348_v41 }
 0x3c7   :  { %1482 = vmatpush.msra.mxu0 %v3349_v42  ;;  %1502 = vmatpush.msrb.mxu1 %v3350_v43 }
 0x3c8   :  { %1522 = vmatpush.msrb.mxu2 %v3351_v44  ;;  %1542 = vmatpush.msrb.mxu3 %v3352_v46 }
 0x3c9   :  { %1483 = vmatpush.msra.mxu0 %v3353_v47  ;;  %1503 = vmatpush.msrb.mxu1 %v3354_v48 }
 0x3ca   :  { %1523 = vmatpush.msrb.mxu2 %v3355_v49  ;;  %1543 = vmatpush.msrb.mxu3 %v3356_v50 }
 0x3cb   :  { %1484 = vmatpush.msra.mxu0 %v3357_v52  ;;  %1504 = vmatpush.msrb.mxu1 %v3358_v53 }
 0x3cc   :  { %1524 = vmatpush.msrb.mxu2 %v3359_v9  ;;  %1544 = vmatpush.msrb.mxu3 %v3360_v56 }
 0x3cd   :  { %1485 = vmatpush.msra.mxu0 %v3361_v2  ;;  %1505 = vmatpush.msrb.mxu1 %v3362_v7 }
 0x3ce   :  { %1525 = vmatpush.msrb.mxu2 %v3363_v59  ;;  %1545 = vmatpush.msrb.mxu3 %v3364_v1 }
 0x3cf   :  { %1486 = vmatpush.msra.mxu0 %v3365_v63  ;;  %1506 = vmatpush.msrb.mxu1 %v3366_v45 }
 0x3d0   :  { %1526 = vmatpush.msrb.mxu2 %v3367_v19  ;;  %1546 = vmatpush.msrb.mxu3 %v3368_v4  ;;  %v3377_v4 = vld [vmem:[#allocation40_spill] sm:$0xff] }
 0x3d1   :  { %1487 = vmatpush.msra.mxu0 %v3369_v55  ;;  %1507 = vmatpush.msrb.mxu1 %v3370_v60  ;;  %v3378_v60 = vld [vmem:[#allocation61_spill] sm:$0xff] }
 0x3d2   :  { %1527 = vmatpush.msrb.mxu2 %v3371_v61  ;;  %1547 = vmatpush.msrb.mxu3 %v3372_v3 }
 0x42e   :  { %v1181_v6 = vpop.f32.mrf.mxu0  ;;  %v1201_v62 = vpop.f32.mrf.mxu1 }
 0x42f   :  { %v1244_v5 = vadd.f32 %v1181_v6, %v3373_v8  ;;  %v1245_v0 = vadd.f32 %v1201_v62, %v3374_v51  ;;  %v3379_v8 = vld [vmem:[#allocation63_spill] sm:$0xff] }
 0x431   :  { %v1741_v58 = vmul.f32 -1.442695, %v1244_v5  ;;  %v1742_v32 = vmul.f32 -1.442695, %v1245_v0 }
 0x433   :  { %1842 = vpow2.f32 %v1741_v58 }
 0x434   :  { %1844 = vpow2.f32 %v1742_v32 }
 0x435   :  { %v1241_v57 = vpop.f32.mrf.mxu3  ;;  %v1221_v14 = vpop.f32.mrf.mxu2 }
 0x436   :  { %v1247_v11 = vadd.f32 %v1241_v57, %v3375_v10  ;;  %v1246_v21 = vadd.f32 %v1221_v14, %v3376_v27 }
 0x438   :  { %v1743_v12 = vmul.f32 -1.442695, %v1247_v11 }
 0x439   :  { %v1843_v36 = vpop.eup %1842 }
 0x43a   :  { %v1845_v25 = vpop.eup %1844  ;;  %v1254_v23 = vadd.f32 1.0, %v1843_v36  ;;  %1846 = vpow2.f32 %v1743_v12 }
 0x43b   :  { %v1255_v13 = vadd.f32 1.0, %v1845_v25  ;;  %v3380_v25 = vld [vmem:[#allocation62_spill] sm:$0xff] }
 0x43c   :  { %1848 = vrcp.f32 %v1254_v23  ;;  %v1267_v18 = vand.u32 2147483648, %v1254_v23  ;;  %v1265_v37 = vand.u32 2147483647, %v1254_v23  ;;  %vm1261_vm0 = vweird.f32 %v1254_v23 }
 0x43d   :  { %1850 = vrcp.f32 %v1255_v13  ;;  %v1282_v33 = vand.u32 2147483648, %v1255_v13  ;;  %v1280_v38 = vand.u32 2147483647, %v1255_v13  ;;  %vm1276_vm1 = vweird.f32 %v1255_v13 }
 0x43e   :  { %v1268_v15 = vor.u32 1.1754944e-38, %v1267_v18  ;;  %vm1266_vm4 = vcmp.eq.f32.partialorder %v1265_v37, 8.507059e+37 }
 0x43f   :  { %v1283_v41 = vor.u32 1.1754944e-38, %v1282_v33  ;;  %vm1281_vm5 = vcmp.eq.f32.partialorder %v1280_v38, 8.507059e+37 }
 0x440   :  { %v1847_v20 = vpop.eup %1846 }
 0x441   :  { %v1293_v28 = vadd.f32 1.0, %v1847_v20 }
 0x442   :  { %v1849_v16 = vpop.eup %1848 }
 0x443   :  { %v1851_v22 = vpop.eup %1850  ;;  %v1257_v30 = vmul.f32 %v1849_v16, %v1254_v23  ;;  %1852 = vrcp.f32 %v1293_v28  ;;  %vm1262_vm14 = vweird.f32 %v1849_v16  ;;  %v1305_v56 = vand.u32 2147483648, %v1293_v28 }
 0x444   :  { %v1272_v29 = vmul.f32 %v1851_v22, %v1255_v13  ;;  %1854 = vtanh.f32 %v1246_v21  ;;  %vm1277_vm15 = vweird.f32 %v1851_v22  ;;  %vm1263_vm2 = vmor %vm1261_vm0, %vm1262_vm14  ;;  %vm1299_vm7 = vweird.f32 %v1293_v28 }
 0x445   :  { %v1258_v17 = vsub.f32 1.0, %v1257_v30  ;;  %vm1278_vm3 = vmor %vm1276_vm1, %vm1277_vm15  ;;  %v1303_v2 = vand.u32 2147483647, %v1293_v28  ;;  %v1306_v59 = vor.u32 1.1754944e-38, %v1305_v56 }
 0x446   :  { %v1273_v40 = vsub.f32 1.0, %v1272_v29 }
 0x447   :  { %v1259_v31 = vmul.f32 %v1849_v16, %v1258_v17  ;;  %vm1304_vm9 = vcmp.eq.f32.partialorder %v1303_v2, 8.507059e+37  ;;  %v1638_v2 = vld [vmem:[#allocation8 + $0x70] sm:$0xff] }
 0x448   :  { %v1274_v39 = vmul.f32 %v1851_v22, %v1273_v40 }
 0x449   :  { %v1853_v26 = vpop.eup %1852  ;;  %v1260_v35 = vadd.f32 %v1849_v16, %v1259_v31 }
 0x44a   :  { %v1275_v24 = vadd.f32 %v1851_v22, %v1274_v39  ;;  %v1295_v54 = vmul.f32 %v1853_v26, %v1293_v28  ;;  %v1855_v43 = vpop.eup %1854  ;;  %vm1300_vm6 = vweird.f32 %v1853_v26 }
 0x44b   :  { %v1264_v42 = vsel %vm1263_vm2, %v1849_v16, %v1260_v35  ;;  %vm1301_vm8 = vmor %vm1299_vm7, %vm1300_vm6 }
 0x44c   :  { %v1269_v44 = vsel %vm1266_vm4, %v1268_v15, %v1264_v42  ;;  %v1279_v46 = vsel %vm1278_vm3, %v1851_v22, %v1275_v24  ;;  %v1296_v47 = vsub.f32 1.0, %v1295_v54 }
 0x44d   :  { %v1284_v48 = vsel %vm1281_vm5, %v1283_v41, %v1279_v46  ;;  %v1288_v49 = vmul.f32 %v1855_v43, %v1269_v44 }
 0x44e   :  { %v1287_v50 = vmul.f32 %v1284_v48, %v2983_v34  ;;  %v1297_v52 = vmul.f32 %v1853_v26, %v1296_v47 }
 0x450   :  { %v3055_v53 = vadd.f32 %v1288_v49, %v1287_v50  ;;  %v1298_v9 = vadd.f32 %v1853_v26, %v1297_v52 }
 0x452   :  { %1856 = vtanh.f32 %v3055_v53  ;;  %v1302_v7 = vsel %vm1301_vm8, %v1853_v26, %v1298_v9 }
 0x453   :  { %v1307_v63 = vsel %vm1304_vm9, %v1306_v59, %v1302_v7  ;;  %v1637_v7 = vld [vmem:[#allocation8 + $0x68] sm:$0xff]  ;;  %v1636_v59 = vld [vmem:[#allocation8 + $0x60] sm:$0xff] }
 0x458   :  { %v1857_v1 = vpop.eup %1856 }
 0x459   :  { %v1310_v45 = vmul.f32 %v1857_v1, %v1307_v63  ;;  %v1635_v1 = vld [vmem:[#allocation8 + $0x58] sm:$0xff]  ;;  %v1634_v63 = vld [vmem:[#allocation8 + $0x50] sm:$0xff] }
 0x45b   :  { %1334 = vmatmul.f32.vlgmr.msrb.gmra.mxu0 %v1310_v45  ;;  %1354 = vmatmul.f32.vlgmr.msra.gmra.mxu1 %v1310_v45 }
 0x45c   :  { %1374 = vmatmul.f32.vlgmr.msra.gmra.mxu2 %v1310_v45  ;;  %1394 = vmatmul.f32.vlgmr.msra.gmra.mxu3 %v1310_v45  ;;  %v1633_v45 = vld [vmem:[#allocation8 + $0x48] sm:$0xff] }
 0x4d8   :  { %v1335_v34 = vpop.f32.mrf.mxu0  ;;  %v1355_v19 = vpop.f32.mrf.mxu1 }
 0x4d9   :  { %v1398_v55 = vadd.f32 %v1335_v34, %v3377_v4  ;;  %v1399_v61 = vadd.f32 %v1355_v19, %v3378_v60  ;;  %v1632_v34 = vld [vmem:[#allocation8 + $0x40] sm:$0xff]  ;;  %v1631_v19 = vld [vmem:[#allocation8 + $0x38] sm:$0xff]  ;;  %v1630_v4 = vld [vmem:[#allocation8 + $0x30] sm:$0xff] }
 0x4db   :  { %v1744_v3 = vmul.f32 -1.442695, %v1398_v55  ;;  %v1745_v6 = vmul.f32 -1.442695, %v1399_v61  ;;  %v3381_v61 = vld [vmem:[#allocation41_spill] sm:$0xff] }
 0x4dd   :  { %1858 = vpow2.f32 %v1744_v3 }
 0x4de   :  { %1860 = vpow2.f32 %v1745_v6  ;;  %v3382_v6 = vld [vmem:[#allocation64_spill] sm:$0xff] }
 0x4df   :  { %v1395_v62 = vpop.f32.mrf.mxu3  ;;  %v1375_v10 = vpop.f32.mrf.mxu2 }
 0x4e0   :  { %v1401_v5 = vadd.f32 %v1395_v62, %v3379_v8  ;;  %v1400_v23 = vadd.f32 %v1375_v10, %v3380_v25  ;;  %v1629_v8 = vld [vmem:[#allocation8 + $0x28] sm:$0xff] }
 0x4e1   :  { %v1625_v10 = vld [vmem:[#allocation8 + $0x8] sm:$0xff] }
 0x4e2   :  { %v1746_v51 = vmul.f32 -1.442695, %v1401_v5 }
 0x4e3   :  { %v1859_v0 = vpop.eup %1858 }
 0x4e4   :  { %v1861_v58 = vpop.eup %1860  ;;  %v1408_v32 = vadd.f32 1.0, %v1859_v0  ;;  %1862 = vpow2.f32 %v1746_v51  ;;  %v1628_v0 = vld [vmem:[#allocation8 + $0x20] sm:$0xff] }
 0x4e5   :  { %v1409_v57 = vadd.f32 1.0, %v1861_v58  ;;  %v1627_v58 = vld [vmem:[#allocation8 + $0x18] sm:$0xff] }
 0x4e6   :  { %1864 = vrcp.f32 %v1408_v32  ;;  %v1421_v27 = vand.u32 2147483648, %v1408_v32  ;;  %v1419_v30 = vand.u32 2147483647, %v1408_v32  ;;  %vm1415_vm12 = vweird.f32 %v1408_v32 }
 0x4e7   :  { %1866 = vrcp.f32 %v1409_v57  ;;  %v1436_v21 = vand.u32 2147483648, %v1409_v57  ;;  %v1434_v17 = vand.u32 2147483647, %v1409_v57  ;;  %vm1430_vm13 = vweird.f32 %v1409_v57 }
 0x4e8   :  { %v1422_v33 = vor.u32 1.1754944e-38, %v1421_v27  ;;  %vm1420_vm0 = vcmp.eq.f32.partialorder %v1419_v30, 8.507059e+37 }
 0x4e9   :  { %v1437_v39 = vor.u32 1.1754944e-38, %v1436_v21  ;;  %vm1435_vm1 = vcmp.eq.f32.partialorder %v1434_v17, 8.507059e+37 }
 0x4ea   :  { %v1863_v11 = vpop.eup %1862 }
 0x4eb   :  { %v1447_v12 = vadd.f32 1.0, %v1863_v11  ;;  %v3383_v11 = vld [vmem:[#allocation66_spill] sm:$0xff] }
 0x4ec   :  { %v1865_v36 = vpop.eup %1864 }
 0x4ed   :  { %v1867_v13 = vpop.eup %1866  ;;  %v1411_v14 = vmul.f32 %v1865_v36, %v1408_v32  ;;  %1868 = vrcp.f32 %v1447_v12  ;;  %vm1416_vm10 = vweird.f32 %v1865_v36  ;;  %v1459_v47 = vand.u32 2147483648, %v1447_v12  ;;  %v1626_v32 = vld [vmem:[#allocation8 + $0x10] sm:$0xff] }
 0x4ee   :  { %v1426_v20 = vmul.f32 %v1867_v13, %v1409_v57  ;;  %1870 = vtanh.f32 %v1400_v23  ;;  %vm1431_vm11 = vweird.f32 %v1867_v13  ;;  %vm1417_vm14 = vmor %vm1415_vm12, %vm1416_vm10  ;;  %vm1453_vm3 = vweird.f32 %v1447_v12 }
 0x4ef   :  { %v1412_v28 = vsub.f32 1.0, %v1411_v14  ;;  %vm1432_vm15 = vmor %vm1430_vm13, %vm1431_vm11  ;;  %v1457_v48 = vand.u32 2147483647, %v1447_v12  ;;  %v1460_v50 = vor.u32 1.1754944e-38, %v1459_v47 }
 0x4f0   :  { %v1427_v16 = vsub.f32 1.0, %v1426_v20 }
 0x4f1   :  { %v1413_v22 = vmul.f32 %v1865_v36, %v1412_v28  ;;  %vm1458_vm5 = vcmp.eq.f32.partialorder %v1457_v48, 8.507059e+37 }
 0x4f2   :  { %v1428_v29 = vmul.f32 %v1867_v13, %v1427_v16 }
 0x4f3   :  { %v1869_v40 = vpop.eup %1868  ;;  %v1414_v18 = vadd.f32 %v1865_v36, %v1413_v22  ;;  %v3384_v22 = vld [vmem:[#allocation65_spill] sm:$0xff] }
 0x4f4   :  { %v1429_v31 = vadd.f32 %v1867_v13, %v1428_v29  ;;  %v1449_v37 = vmul.f32 %v1869_v40, %v1447_v12  ;;  %v1871_v26 = vpop.eup %1870  ;;  %vm1454_vm2 = vweird.f32 %v1869_v40 }
 0x4f5   :  { %v1418_v38 = vsel %vm1417_vm14, %v1865_v36, %v1414_v18  ;;  %vm1455_vm4 = vmor %vm1453_vm3, %vm1454_vm2  ;;  %v1624_v36 = vld [vmem:[#allocation8] sm:$0xff] }
 0x4f6   :  { %v1423_v35 = vsel %vm1420_vm0, %v1422_v33, %v1418_v38  ;;  %v1433_v15 = vsel %vm1432_vm15, %v1867_v13, %v1429_v31  ;;  %v1450_v24 = vsub.f32 1.0, %v1449_v37 }
 0x4f7   :  { %v1438_v54 = vsel %vm1435_vm1, %v1437_v39, %v1433_v15  ;;  %v1442_v41 = vmul.f32 %v1871_v26, %v1423_v35 }
 0x4f8   :  { %v1441_v42 = vmul.f32 %v1438_v54, %v3055_v53  ;;  %v1451_v43 = vmul.f32 %v1869_v40, %v1450_v24  ;;  %v1639_v53 = vld [vmem:[#allocation8 + $0x78] sm:$0xff] }
 0x4f9   :  { %1644 = vmatpush.msrb.mxu0 %v1639_v53 }
 0x4fa   :  { %v3063_v44 = vadd.f32 %v1442_v41, %v1441_v42  ;;  %v1452_v46 = vadd.f32 %v1869_v40, %v1451_v43 }
 0x4fb   :  { %1645 = vmatpush.msrb.mxu0 %v1638_v2 }
 0x4fc   :  { %1872 = vtanh.f32 %v3063_v44  ;;  %v1456_v49 = vsel %vm1455_vm4, %v1869_v40, %v1452_v46 }
 0x4fd   :  { %v1461_v9 = vsel %vm1458_vm5, %v1460_v50, %v1456_v49  ;;  %1646 = vmatpush.msrb.mxu0 %v1637_v7 }
 0x4ff   :  { %1647 = vmatpush.msrb.mxu0 %v1636_v59 }
 0x501   :  { %1648 = vmatpush.msrb.mxu0 %v1635_v1 }
 0x502   :  { %v1873_v52 = vpop.eup %1872 }
 0x503   :  { %v1464_v56 = vmul.f32 %v1873_v52, %v1461_v9  ;;  %1649 = vmatpush.msrb.mxu0 %v1634_v63 }
 0x505   :  { %1488 = vmatmul.f32.vlgmr.msra.gmra.mxu0 %v1464_v56  ;;  %1508 = vmatmul.f32.vlgmr.msrb.gmra.mxu1 %v1464_v56 }
 0x506   :  { %1528 = vmatmul.f32.vlgmr.msrb.gmra.mxu2 %v1464_v56  ;;  %1548 = vmatmul.f32.vlgmr.msrb.gmra.mxu3 %v1464_v56 }
 0x507   :  { %1650 = vmatpush.msrb.mxu0 %v1633_v45 }
 0x509   :  { %1651 = vmatpush.msrb.mxu0 %v1632_v34 }
 0x50b   :  { %1652 = vmatpush.msrb.mxu0 %v1631_v19 }
 0x50d   :  { %1653 = vmatpush.msrb.mxu0 %v1630_v4 }
 0x50f   :  { %1654 = vmatpush.msrb.mxu0 %v1629_v8 }
 0x511   :  { %1655 = vmatpush.msrb.mxu0 %v1628_v0 }
 0x513   :  { %1656 = vmatpush.msrb.mxu0 %v1627_v58 }
 0x515   :  { %1657 = vmatpush.msrb.mxu0 %v1626_v32 }
 0x517   :  { %1658 = vmatpush.msrb.mxu0 %v1625_v10 }
 0x519   :  { %1659 = vmatpush.msrb.mxu0 %v1624_v36 }
 0x582   :  { %v1489_v55 = vpop.f32.mrf.mxu0  ;;  %v1509_v60 = vpop.f32.mrf.mxu1 }
 0x583   :  { %v1552_v3 = vadd.f32 %v1489_v55, %v3381_v61  ;;  %v1553_v62 = vadd.f32 %v1509_v60, %v3382_v6 }
 0x585   :  { %v1747_v5 = vmul.f32 -1.442695, %v1552_v3  ;;  %v1748_v51 = vmul.f32 -1.442695, %v1553_v62 }
 0x587   :  { %1874 = vpow2.f32 %v1747_v5 }
 0x588   :  { %1876 = vpow2.f32 %v1748_v51 }
 0x589   :  { %v1549_v57 = vpop.f32.mrf.mxu3  ;;  %v1529_v28 = vpop.f32.mrf.mxu2 }
 0x58a   :  { %v1555_v12 = vadd.f32 %v1549_v57, %v3383_v11  ;;  %v1554_v30 = vadd.f32 %v1529_v28, %v3384_v22 }
 0x58c   :  { %v1749_v25 = vmul.f32 -1.442695, %v1555_v12 }
 0x58d   :  { %v1875_v23 = vpop.eup %1874 }
 0x58e   :  { %v1877_v13 = vpop.eup %1876  ;;  %v1562_v14 = vadd.f32 1.0, %v1875_v23  ;;  %1878 = vpow2.f32 %v1749_v25 }
 0x58f   :  { %v1563_v20 = vadd.f32 1.0, %v1877_v13 }
 0x590   :  { %1880 = vrcp.f32 %v1562_v14  ;;  %v1575_v31 = vand.u32 2147483648, %v1562_v14  ;;  %v1573_v38 = vand.u32 2147483647, %v1562_v14  ;;  %vm1569_vm8 = vweird.f32 %v1562_v14 }
 0x591   :  { %1882 = vrcp.f32 %v1563_v20  ;;  %v1590_v37 = vand.u32 2147483648, %v1563_v20  ;;  %v1588_v35 = vand.u32 2147483647, %v1563_v20  ;;  %vm1584_vm9 = vweird.f32 %v1563_v20 }
 0x592   :  { %v1576_v54 = vor.u32 1.1754944e-38, %v1575_v31  ;;  %vm1574_vm12 = vcmp.eq.f32.partialorder %v1573_v38, 8.507059e+37 }
 0x593   :  { %v1591_v43 = vor.u32 1.1754944e-38, %v1590_v37  ;;  %vm1589_vm13 = vcmp.eq.f32.partialorder %v1588_v35, 8.507059e+37 }
 0x594   :  { %v1879_v16 = vpop.eup %1878 }
 0x595   :  { %v1601_v27 = vadd.f32 1.0, %v1879_v16 }
 0x596   :  { %v1881_v21 = vpop.eup %1880 }
 0x597   :  { %v1883_v29 = vpop.eup %1882  ;;  %v1565_v17 = vmul.f32 %v1881_v21, %v1562_v14  ;;  %1884 = vrcp.f32 %v1601_v27  ;;  %vm1570_vm6 = vweird.f32 %v1881_v21  ;;  %v1613_v59 = vand.u32 2147483648, %v1601_v27 }
 0x598   :  { %v1580_v40 = vmul.f32 %v1883_v29, %v1563_v20  ;;  %1886 = vtanh.f32 %v1554_v30  ;;  %vm1585_vm7 = vweird.f32 %v1883_v29  ;;  %vm1571_vm10 = vmor %vm1569_vm8, %vm1570_vm6  ;;  %vm1607_vm15 = vweird.f32 %v1601_v27 }
 0x599   :  { %v1566_v18 = vsub.f32 1.0, %v1565_v17  ;;  %vm1586_vm11 = vmor %vm1584_vm9, %vm1585_vm7  ;;  %v1611_v1 = vand.u32 2147483647, %v1601_v27  ;;  %v1614_v45 = vor.u32 1.1754944e-38, %v1613_v59 }
 0x59a   :  { %v1581_v33 = vsub.f32 1.0, %v1580_v40 }
 0x59b   :  { %v1567_v39 = vmul.f32 %v1881_v21, %v1566_v18  ;;  %vm1612_vm1 = vcmp.eq.f32.partialorder %v1611_v1, 8.507059e+37 }
 0x59c   :  { %v1582_v26 = vmul.f32 %v1883_v29, %v1581_v33 }
 0x59d   :  { %v1885_v15 = vpop.eup %1884  ;;  %v1568_v24 = vadd.f32 %v1881_v21, %v1567_v39 }
 0x59e   :  { %v1583_v41 = vadd.f32 %v1883_v29, %v1582_v26  ;;  %v1603_v42 = vmul.f32 %v1885_v15, %v1601_v27  ;;  %v1887_v47 = vpop.eup %1886  ;;  %vm1608_vm14 = vweird.f32 %v1885_v15 }
 0x59f   :  { %v1572_v46 = vsel %vm1571_vm10, %v1881_v21, %v1568_v24  ;;  %vm1609_vm0 = vmor %vm1607_vm15, %vm1608_vm14 }
 0x5a0   :  { %v1577_v48 = vsel %vm1574_vm12, %v1576_v54, %v1572_v46  ;;  %v1587_v49 = vsel %vm1586_vm11, %v1883_v29, %v1583_v41  ;;  %v1604_v50 = vsub.f32 1.0, %v1603_v42 }
 0x5a1   :  { %v1592_v52 = vsel %vm1589_vm13, %v1591_v43, %v1587_v49  ;;  %v1596_v9 = vmul.f32 %v1887_v47, %v1577_v48 }
 0x5a2   :  { %v1595_v56 = vmul.f32 %v1592_v52, %v3063_v44  ;;  %v1605_v53 = vmul.f32 %v1885_v15, %v1604_v50  ;;  %v1761_v44 = vld [vmem:[%s3082_s5] ss:$0 sm:$0xff] }
 0x5a4   :  { %v1597_v2 = vadd.f32 %v1596_v9, %v1595_v56  ;;  %v1606_v7 = vadd.f32 %v1885_v15, %v1605_v53 }
 0x5a6   :  { %1888 = vtanh.f32 %v1597_v2  ;;  %v1610_v63 = vsel %vm1609_vm0, %v1885_v15, %v1606_v7 }
 0x5a7   :  { %v1615_v19 = vsel %vm1612_vm1, %v1614_v45, %v1610_v63 }
 0x5ac   :  { %v1889_v34 = vpop.eup %1888 }
 0x5ad   :  { %v1618_v4 = vmul.f32 %v1889_v34, %v1615_v19 }
 0x5af   :  { %1660 = vmatmul.f32.vlgmr.msrb.gmra.mxu0 %v1618_v4 }
 0x62c   :  { %v1661_v55 = vpop.f32.mrf.mxu0 }
 0x62d   :  { %v1662_v60 = vadd.f32 %v1761_v44, %v1661_v55 }
 0x62f   :  { %1664 = vst [vmem:[#allocation10] sm:$0xff] %v1662_v60 }
 0x630   :  { %1675 = dma.vmem_to_hbm [thread:$0]  %s1671_s7, 128, %s1673_s10, [#allocation7]  }
 0x631   :  { %2030 = dma.done.wait [#allocation7], 128  }
 0x632   :  { %2031 = vsyncadd [#allocation7], 4294967168 }
 0x633   :  { %1680 = vsyncpa [#allocation6], 1 }
 0x634   :  { %1681 = vsyncpa [#allocation9], 1 }
 0x635   :  { %1682 = vsyncpa [#allocation7], 1 }

</bundles_post_ra>
